<compile_context>
chip_gen: v6e
topology: v6e:2x2x1
jax: 0.10.0
libtpu: 0.0.40
codegen_flags: <defaults>
</compile_context>

<pallas_src>
import jax
import jax.numpy as jnp
from jax.experimental import pallas as pl
from jax.experimental.pallas import tpu as pltpu


def _round_up(x, m):
    return (x + m - 1) // m * m


# ---------------------------------------------------------------------------
# Fused Pallas kernel: all GIN layers unrolled in one grid-less pallas_call
# ---------------------------------------------------------------------------
def _make_gin_kernel(n_layers):
    def kernel(eps_ref, adj_ref, x_ref, *rest):
        # rest = [w1_0, b1_0, w2_0, b2_0, ..., w1_{L-1}, b1_{L-1}, w2_{L-1}, b2_{L-1}, out_ref]
        out_ref = rest[-1]
        wrefs = rest[:-1]

        adj = adj_ref[...]                 # [N_pad, N_pad]  resident, loaded once
        x = x_ref[...]                     # [N_pad, D0_pad] layer-to-layer carry (values/vregs)

        for l in range(n_layers):          # static unroll: no grid steps, no pl.when
            w1 = wrefs[4 * l][...]         # [Din_pad, Dout_pad]
            b1 = wrefs[4 * l + 1][...]     # [1, Dout_pad]
            w2 = wrefs[4 * l + 2][...]     # [Dout_pad, Dout_pad]
            b2 = wrefs[4 * l + 3][...]     # [1, Dout_pad]
            eps = eps_ref[l]               # SMEM scalar

            # Neighborhood add-aggregation on the MXU: S = A @ X, A[dst, src] = multiplicity.
            s = jnp.dot(adj, x, preferred_element_type=jnp.float32)
            # Z = (1 + eps) * X + S
            z = (1.0 + eps) * x + s
            # MLP: Linear -> ReLU -> Linear (zero-padded weights; exact).
            h = jnp.maximum(jnp.dot(z, w1, preferred_element_type=jnp.float32) + b1, 0.0)
            x = jnp.dot(h, w2, preferred_element_type=jnp.float32) + b2

        out_ref[...] = x.astype(out_ref.dtype)

    return kernel


def _vmem_footprint_bytes(n_pad, din_pads, dout_pads):
    """VMEM footprint (single-buffered: no grid, so no pipelining buffers), f32."""
    f32 = 4
    total = n_pad * n_pad * f32                       # adjacency
    total += n_pad * din_pads[0] * f32                # X input
    total += n_pad * dout_pads[-1] * f32              # output
    for dip, dop in zip(din_pads, dout_pads):
        total += (dip * dop + dop * dop + 2 * 8 * dop) * f32   # W1, W2, b1, b2 (8-sublane pad)
    total += 4 * n_pad * max(din_pads + dout_pads) * f32       # live intermediates (x, s, z, h)
    return total


# ---------------------------------------------------------------------------
# Host-side glue: parameter init, padding, adjacency densification
# ---------------------------------------------------------------------------
def init_gin_params(key, n_layers, in_dims, hidden_dims, out_dims):
    """Deterministic parameter init matching the module's layer-dimension schedule."""
    dims = []
    d = in_dims
    for _ in range(n_layers - 1):
        dims.append((d, hidden_dims))
        d = hidden_dims
    dims.append((hidden_dims, out_dims))

    params = []
    for (din, dout) in dims:
        key, k_eps, k_w1, k_b1, k_w2, k_b2 = jax.random.split(key, 6)
        scale1 = 1.0 / jnp.sqrt(jnp.float32(din))
        scale2 = 1.0 / jnp.sqrt(jnp.float32(dout))
        params.append(dict(
            eps=jax.random.normal(k_eps, (1, 1), jnp.float32),          # torch.randn(1)
            w1=jax.random.uniform(k_w1, (din, dout), jnp.float32, -scale1, scale1),
            b1=jax.random.uniform(k_b1, (1, dout), jnp.float32, -scale1, scale1),
            w2=jax.random.uniform(k_w2, (dout, dout), jnp.float32, -scale2, scale2),
            b2=jax.random.uniform(k_b2, (1, dout), jnp.float32, -scale2, scale2),
        ))
    return params


def edge_index_to_adj(edge_index, num_nodes):
    """Dense adjacency for add-aggregation: A[dst, src] += 1 for each edge src->dst."""
    src, dst = edge_index[0], edge_index[1]
    adj = jnp.zeros((num_nodes, num_nodes), jnp.float32)
    return adj.at[dst, src].add(1.0)


def gin_forward(x, adj, params):
    n, d_in = x.shape
    n_layers = len(params)
    d_out = params[-1]["w2"].shape[1]

    # Lane-dense padding: N is the lane/contraction axis of A@X -> round to 128.
    n_pad = _round_up(n, 128)
    # Per-layer padded widths (no global max-dim padding; heterogeneous widths stay cheap).
    din_pads = [_round_up(p["w1"].shape[0], 128) for p in params]
    dout_pads = [_round_up(p["w1"].shape[1], 128) for p in params]
    for l in range(1, n_layers):
        assert din_pads[l] == dout_pads[l - 1], "layer width chain mismatch"
    assert din_pads[0] == _round_up(d_in, 128)

    need = _vmem_footprint_bytes(n_pad, din_pads, dout_pads)
    # 48 MiB resident-path cap fits v7x's 64 MiB physical VMEM with headroom and is well
    # inside v5e/v6e's 128 MiB.  Larger graphs need the tiled-aggregation path (TODO above).
    assert need <= (48 << 20), (
        f"GIN fused kernel footprint {need} B exceeds the fully-resident budget; "
        f"tile the aggregation for graphs this large."
    )
    vmem_limit = int(min(max(need + (8 << 20), 32 << 20), 48 << 20))

    # Pad inputs (exact: padded rows/cols are zero and never feed real rows).
    x_pad = jnp.pad(x, ((0, n_pad - n), (0, din_pads[0] - d_in)))
    adj_pad = jnp.pad(adj, ((0, n_pad - n), (0, n_pad - n)))
    eps_all = jnp.concatenate([p["eps"].reshape(1) for p in params]).astype(jnp.float32)

    flat_weights = []
    for l, p in enumerate(params):
        dip, dop = din_pads[l], dout_pads[l]
        w1 = jnp.pad(p["w1"], ((0, dip - p["w1"].shape[0]), (0, dop - p["w1"].shape[1])))
        b1 = jnp.pad(p["b1"], ((0, 0), (0, dop - p["b1"].shape[1])))
        w2 = jnp.pad(p["w2"], ((0, dop - p["w2"].shape[0]), (0, dop - p["w2"].shape[1])))
        b2 = jnp.pad(p["b2"], ((0, 0), (0, dop - p["b2"].shape[1])))
        flat_weights += [w1, b1, w2, b2]

    kernel = _make_gin_kernel(n_layers)
    in_specs = (
        [pl.BlockSpec(memory_space=pltpu.MemorySpace.SMEM)]                  # eps [L] (scalar path)
        + [pl.BlockSpec(memory_space=pltpu.MemorySpace.VMEM)] * (2 + 4 * n_layers)
    )

    out_pad = pl.pallas_call(
        kernel,
        out_shape=jax.ShapeDtypeStruct((n_pad, dout_pads[-1]), jnp.float32),
        in_specs=in_specs,
        out_specs=pl.BlockSpec(memory_space=pltpu.MemorySpace.VMEM),
        compiler_params=pltpu.CompilerParams(vmem_limit_bytes=vmem_limit),
    )(eps_all, adj_pad, x_pad, *flat_weights)

    return out_pad[:n, :d_out]


# ---------------------------------------------------------------------------
# Pure-JAX reference (for a sanity check)
# ---------------------------------------------------------------------------
def gin_reference(x, adj, params):
    for p in params:
        s = adj @ x
        z = (1.0 + p["eps"][0, 0]) * x + s
        h = jnp.maximum(z @ p["w1"] + p["b1"], 0.0)
        x = h @ p["w2"] + p["b2"]
    return x


if __name__ == "__main__":
    key = jax.random.PRNGKey(0)

    # Small graph: N nodes, ring edges plus a few random edges.
    N, IN_DIMS, HIDDEN_DIMS, OUT_DIMS, N_LAYERS = 16, 16, 32, 8, 3

    key, k_x, k_e, k_p = jax.random.split(key, 4)
    X = jax.random.normal(k_x, (N, IN_DIMS), jnp.float32)

    ring_src = jnp.arange(N, dtype=jnp.int32)
    ring_dst = (ring_src + 1) % N
    extra_src = jax.random.randint(k_e, (8,), 0, N, jnp.int32)
    extra_dst = (extra_src + 3) % N
    edge_index = jnp.stack([jnp.concatenate([ring_src, extra_src]),
                            jnp.concatenate([ring_dst, extra_dst])], axis=0)  # [2, E]

    adj = edge_index_to_adj(edge_index, N)
    params = init_gin_params(k_p, N_LAYERS, IN_DIMS, HIDDEN_DIMS, OUT_DIMS)

    out = gin_forward(X, adj, params)
    out = jax.block_until_ready(out)

    ref = gin_reference(X, adj, params)
    assert out.shape == (N, OUT_DIMS)
    assert jnp.allclose(out, ref, atol=1e-4, rtol=1e-4), "Pallas output mismatch vs reference"

    print("KERNEL_OK")
</pallas_src>

<mosaic_0001>
module attributes {stable_mosaic.version = 11 : i64} {
  func.func @kernel(%arg0: memref<3xf32, #tpu.memory_space<smem>>, %arg1: memref<128x128xf32, #tpu.memory_space<vmem>>, %arg2: memref<128x128xf32, #tpu.memory_space<vmem>>, %arg3: memref<128x128xf32, #tpu.memory_space<vmem>>, %arg4: memref<1x128xf32, #tpu.memory_space<vmem>>, %arg5: memref<128x128xf32, #tpu.memory_space<vmem>>, %arg6: memref<1x128xf32, #tpu.memory_space<vmem>>, %arg7: memref<128x128xf32, #tpu.memory_space<vmem>>, %arg8: memref<1x128xf32, #tpu.memory_space<vmem>>, %arg9: memref<128x128xf32, #tpu.memory_space<vmem>>, %arg10: memref<1x128xf32, #tpu.memory_space<vmem>>, %arg11: memref<128x128xf32, #tpu.memory_space<vmem>>, %arg12: memref<1x128xf32, #tpu.memory_space<vmem>>, %arg13: memref<128x128xf32, #tpu.memory_space<vmem>>, %arg14: memref<1x128xf32, #tpu.memory_space<vmem>>, %arg15: memref<128x128xf32, #tpu.memory_space<vmem>>) attributes {dimension_semantics = [], scalar_prefetch = 0 : i64, scratch_operands = 0 : i64, tpu.core_type = #tpu.core_type<tc>} {
    %c0 = arith.constant 0 : index
    %c0_0 = arith.constant 0 : index
    %0 = vector.load %arg1[%c0, %c0_0] : memref<128x128xf32, #tpu.memory_space<vmem>>, vector<128x128xf32>
    %c0_1 = arith.constant 0 : index
    %c0_2 = arith.constant 0 : index
    %1 = vector.load %arg2[%c0_1, %c0_2] : memref<128x128xf32, #tpu.memory_space<vmem>>, vector<128x128xf32>
    %c0_3 = arith.constant 0 : index
    %c0_4 = arith.constant 0 : index
    %2 = vector.load %arg3[%c0_3, %c0_4] : memref<128x128xf32, #tpu.memory_space<vmem>>, vector<128x128xf32>
    %c0_5 = arith.constant 0 : index
    %c0_6 = arith.constant 0 : index
    %3 = vector.load %arg4[%c0_5, %c0_6] : memref<1x128xf32, #tpu.memory_space<vmem>>, vector<1x128xf32>
    %c0_7 = arith.constant 0 : index
    %c0_8 = arith.constant 0 : index
    %4 = vector.load %arg5[%c0_7, %c0_8] : memref<128x128xf32, #tpu.memory_space<vmem>>, vector<128x128xf32>
    %c0_9 = arith.constant 0 : index
    %c0_10 = arith.constant 0 : index
    %5 = vector.load %arg6[%c0_9, %c0_10] : memref<1x128xf32, #tpu.memory_space<vmem>>, vector<1x128xf32>
    %c0_11 = arith.constant 0 : index
    %6 = memref.load %arg0[%c0_11] : memref<3xf32, #tpu.memory_space<smem>>
    %cst = arith.constant dense<0.000000e+00> : vector<128x128xf32>
    %7 = tpu.matmul %0, %1, %cst {dimension_numbers = #tpu.dot_dimension_numbers<[1], [0], [0], [1], [0, 0, 1, 1], [], []>} : vector<128x128xf32>, vector<128x128xf32>, vector<128x128xf32> -> vector<128x128xf32>
    %cst_12 = arith.constant 1.000000e+00 : f32
    %8 = arith.addf %cst_12, %6 : f32
    %9 = vector.broadcast %8 : f32 to vector<128x128xf32>
    %10 = arith.mulf %9, %1 : vector<128x128xf32>
    %11 = arith.addf %10, %7 : vector<128x128xf32>
    %cst_13 = arith.constant dense<0.000000e+00> : vector<128x128xf32>
    %12 = tpu.matmul %11, %2, %cst_13 {dimension_numbers = #tpu.dot_dimension_numbers<[1], [0], [0], [1], [0, 0, 1, 1], [], []>} : vector<128x128xf32>, vector<128x128xf32>, vector<128x128xf32> -> vector<128x128xf32>
    %13 = vector.broadcast %3 : vector<1x128xf32> to vector<128x128xf32>
    %14 = arith.addf %12, %13 : vector<128x128xf32>
    %cst_14 = arith.constant 0.000000e+00 : f32
    %15 = vector.broadcast %cst_14 : f32 to vector<128x128xf32>
    %16 = arith.maximumf %14, %15 : vector<128x128xf32>
    %cst_15 = arith.constant dense<0.000000e+00> : vector<128x128xf32>
    %17 = tpu.matmul %16, %4, %cst_15 {dimension_numbers = #tpu.dot_dimension_numbers<[1], [0], [0], [1], [0, 0, 1, 1], [], []>} : vector<128x128xf32>, vector<128x128xf32>, vector<128x128xf32> -> vector<128x128xf32>
    %18 = vector.broadcast %5 : vector<1x128xf32> to vector<128x128xf32>
    %19 = arith.addf %17, %18 : vector<128x128xf32>
    %c0_16 = arith.constant 0 : index
    %c0_17 = arith.constant 0 : index
    %20 = vector.load %arg7[%c0_16, %c0_17] : memref<128x128xf32, #tpu.memory_space<vmem>>, vector<128x128xf32>
    %c0_18 = arith.constant 0 : index
    %c0_19 = arith.constant 0 : index
    %21 = vector.load %arg8[%c0_18, %c0_19] : memref<1x128xf32, #tpu.memory_space<vmem>>, vector<1x128xf32>
    %c0_20 = arith.constant 0 : index
    %c0_21 = arith.constant 0 : index
    %22 = vector.load %arg9[%c0_20, %c0_21] : memref<128x128xf32, #tpu.memory_space<vmem>>, vector<128x128xf32>
    %c0_22 = arith.constant 0 : index
    %c0_23 = arith.constant 0 : index
    %23 = vector.load %arg10[%c0_22, %c0_23] : memref<1x128xf32, #tpu.memory_space<vmem>>, vector<1x128xf32>
    %c1 = arith.constant 1 : index
    %24 = memref.load %arg0[%c1] : memref<3xf32, #tpu.memory_space<smem>>
    %cst_24 = arith.constant dense<0.000000e+00> : vector<128x128xf32>
    %25 = tpu.matmul %0, %19, %cst_24 {dimension_numbers = #tpu.dot_dimension_numbers<[1], [0], [0], [1], [0, 0, 1, 1], [], []>} : vector<128x128xf32>, vector<128x128xf32>, vector<128x128xf32> -> vector<128x128xf32>
    %cst_25 = arith.constant 1.000000e+00 : f32
    %26 = arith.addf %cst_25, %24 : f32
    %27 = vector.broadcast %26 : f32 to vector<128x128xf32>
    %28 = arith.mulf %27, %19 : vector<128x128xf32>
    %29 = arith.addf %28, %25 : vector<128x128xf32>
    %cst_26 = arith.constant dense<0.000000e+00> : vector<128x128xf32>
    %30 = tpu.matmul %29, %20, %cst_26 {dimension_numbers = #tpu.dot_dimension_numbers<[1], [0], [0], [1], [0, 0, 1, 1], [], []>} : vector<128x128xf32>, vector<128x128xf32>, vector<128x128xf32> -> vector<128x128xf32>
    %31 = vector.broadcast %21 : vector<1x128xf32> to vector<128x128xf32>
    %32 = arith.addf %30, %31 : vector<128x128xf32>
    %cst_27 = arith.constant 0.000000e+00 : f32
    %33 = vector.broadcast %cst_27 : f32 to vector<128x128xf32>
    %34 = arith.maximumf %32, %33 : vector<128x128xf32>
    %cst_28 = arith.constant dense<0.000000e+00> : vector<128x128xf32>
    %35 = tpu.matmul %34, %22, %cst_28 {dimension_numbers = #tpu.dot_dimension_numbers<[1], [0], [0], [1], [0, 0, 1, 1], [], []>} : vector<128x128xf32>, vector<128x128xf32>, vector<128x128xf32> -> vector<128x128xf32>
    %36 = vector.broadcast %23 : vector<1x128xf32> to vector<128x128xf32>
    %37 = arith.addf %35, %36 : vector<128x128xf32>
    %c0_29 = arith.constant 0 : index
    %c0_30 = arith.constant 0 : index
    %38 = vector.load %arg11[%c0_29, %c0_30] : memref<128x128xf32, #tpu.memory_space<vmem>>, vector<128x128xf32>
    %c0_31 = arith.constant 0 : index
    %c0_32 = arith.constant 0 : index
    %39 = vector.load %arg12[%c0_31, %c0_32] : memref<1x128xf32, #tpu.memory_space<vmem>>, vector<1x128xf32>
    %c0_33 = arith.constant 0 : index
    %c0_34 = arith.constant 0 : index
    %40 = vector.load %arg13[%c0_33, %c0_34] : memref<128x128xf32, #tpu.memory_space<vmem>>, vector<128x128xf32>
    %c0_35 = arith.constant 0 : index
    %c0_36 = arith.constant 0 : index
    %41 = vector.load %arg14[%c0_35, %c0_36] : memref<1x128xf32, #tpu.memory_space<vmem>>, vector<1x128xf32>
    %c2 = arith.constant 2 : index
    %42 = memref.load %arg0[%c2] : memref<3xf32, #tpu.memory_space<smem>>
    %cst_37 = arith.constant dense<0.000000e+00> : vector<128x128xf32>
    %43 = tpu.matmul %0, %37, %cst_37 {dimension_numbers = #tpu.dot_dimension_numbers<[1], [0], [0], [1], [0, 0, 1, 1], [], []>} : vector<128x128xf32>, vector<128x128xf32>, vector<128x128xf32> -> vector<128x128xf32>
    %cst_38 = arith.constant 1.000000e+00 : f32
    %44 = arith.addf %cst_38, %42 : f32
    %45 = vector.broadcast %44 : f32 to vector<128x128xf32>
    %46 = arith.mulf %45, %37 : vector<128x128xf32>
    %47 = arith.addf %46, %43 : vector<128x128xf32>
    %cst_39 = arith.constant dense<0.000000e+00> : vector<128x128xf32>
    %48 = tpu.matmul %47, %38, %cst_39 {dimension_numbers = #tpu.dot_dimension_numbers<[1], [0], [0], [1], [0, 0, 1, 1], [], []>} : vector<128x128xf32>, vector<128x128xf32>, vector<128x128xf32> -> vector<128x128xf32>
    %49 = vector.broadcast %39 : vector<1x128xf32> to vector<128x128xf32>
    %50 = arith.addf %48, %49 : vector<128x128xf32>
    %cst_40 = arith.constant 0.000000e+00 : f32
    %51 = vector.broadcast %cst_40 : f32 to vector<128x128xf32>
    %52 = arith.maximumf %50, %51 : vector<128x128xf32>
    %cst_41 = arith.constant dense<0.000000e+00> : vector<128x128xf32>
    %53 = tpu.matmul %52, %40, %cst_41 {dimension_numbers = #tpu.dot_dimension_numbers<[1], [0], [0], [1], [0, 0, 1, 1], [], []>} : vector<128x128xf32>, vector<128x128xf32>, vector<128x128xf32> -> vector<128x128xf32>
    %54 = vector.broadcast %41 : vector<1x128xf32> to vector<128x128xf32>
    %55 = arith.addf %53, %54 : vector<128x128xf32>
    %c0_42 = arith.constant 0 : index
    %c0_43 = arith.constant 0 : index
    %56 = vector.load %arg15[%c0_42, %c0_43] : memref<128x128xf32, #tpu.memory_space<vmem>>, vector<128x128xf32>
    tpu.vector_store %arg15[%c0_42, %c0_43], %55 {strides = array<i32>} : memref<128x128xf32, #tpu.memory_space<vmem>>, vector<128x128xf32>,
    return
  }
}

</mosaic_0001>

<bundles_post_ra>
// kernel: tpu_custom_call.1
= control target key start
LH: loop header
LB: loop body
LE: loop exit
PB: predicated region body
PF: predicated region fallthrough
CT: control target
= control target key end

     0   :  { %20 = vsyncpa [#allocation5], 0  ;;  %s3442_s0 = inlined_call_operand.hbm [shape: f32[3], index: 0, kind: input, shape index: {}]   ;;  %s3443_s1 = inlined_call_operand.hbm [shape: f32[128,128], index: 1, kind: input, shape index: {}]   ;;  %s3444_s2 = inlined_call_operand.hbm [shape: f32[128,128], index: 2, kind: input, shape index: {}]   ;;  %s3445_s3 = inlined_call_operand.hbm [shape: f32[128,128], index: 3, kind: input, shape index: {}]   ;;  %s3446_s4 = inlined_call_operand.vmem [shape: f32[1,128], index: 4, kind: input, shape index: {}]   ;;  %s3447_s5 = inlined_call_operand.hbm [shape: f32[128,128], index: 5, kind: input, shape index: {}]   ;;  %s3448_s6 = inlined_call_operand.vmem [shape: f32[1,128], index: 6, kind: input, shape index: {}]   ;;  %s3449_s7 = inlined_call_operand.hbm [shape: f32[128,128], index: 7, kind: input, shape index: {}]   ;;  %s3450_s8 = inlined_call_operand.vmem [shape: f32[1,128], index: 8, kind: input, shape index: {}]   ;;  %s3451_s9 = inlined_call_operand.hbm [shape: f32[128,128], index: 9, kind: input, shape index: {}]   ;;  %s3452_s10 = inlined_call_operand.vmem [shape: f32[1,128], index: 10, kind: input, shape index: {}]   ;;  %s3453_s11 = inlined_call_operand.hbm [shape: f32[128,128], index: 11, kind: input, shape index: {}]   ;;  %s3454_s12 = inlined_call_operand.vmem [shape: f32[1,128], index: 12, kind: input, shape index: {}]   ;;  %s3455_s13 = inlined_call_operand.hbm [shape: f32[128,128], index: 13, kind: input, shape index: {}]   ;;  %s3456_s14 = inlined_call_operand.vmem [shape: f32[1,128], index: 14, kind: input, shape index: {}]   ;;  %s3457_s15 = inlined_call_operand.hbm [shape: f32[128,128], index: 15, kind: output, shape index: {}]  }
   0x1   :  { %21 = vsyncpa [#allocation3], 0 }
   0x2   :  { %22 = vsyncpa [#allocation8], 0 }
   0x3   :  { %23 = vsyncpa [#allocation11], 0 }
   0x4   :  { %24 = vsyncpa [#allocation14], 0 }
   0x5   :  { %25 = vsyncpa [#allocation17], 0 }
   0x6   :  { %26 = vsyncpa [#allocation4], 0  ;;  %s2899_s18 = smov [#allocation7]   ;;  %s2900_s20 = smov [#allocation10]  }
   0x7   :  { %s52_s19 = sshll.u32 %s2899_s18, 4  ;;  %s78_s21 = sshll.u32 %s2900_s20, 4  ;;  %s53_s19 = int_to_ptr.vmem [resolvable:$true] %s52_s19  ;;  %s79_s21 = int_to_ptr.vmem [resolvable:$true] %s78_s21 }
   0x8   :  { %s2705_s22 = scalar_lea.vmem %s53_s19, 2048  ;;  %p2710_p1 = scmp.lt.s32.totalorder %s53_s19, %s53_s19 }
   0x9   :  { %p2706_p0 = scmp.ne.s32.totalorder %s53_s19, %s2705_s22  ;;  %p2711_p2 = scmp.lt.s32.totalorder %s2705_s22, %s2705_s22 }
   0xb   :  { %p2712_p3 = por %p2711_p2, %p2710_p1 }
   0xd   :  { %p2713_p4 = pnand %p2712_p3, %p2706_p0 }
   0xf   :  { %2716 = shalt.err (!%p2713_p4)
}
  0x10   :  { %s2901_s23 = smov 128   ;;  %s2902_s24 = smov 8  }
  0x11   :  { %58 = dma.hbm_to_vmem [thread:$0]  %s3444_s2, 2048, %s53_s19, [#allocation8], %s2901_s23, %s2901_s23, %s2902_s24  }
  0x12   :  { %s2725_s27 = scalar_lea.vmem %s79_s21, 2048  ;;  %p2730_p6 = scmp.lt.s32.totalorder %s79_s21, %s79_s21 }
  0x13   :  { %p2726_p5 = scmp.ne.s32.totalorder %s79_s21, %s2725_s27  ;;  %p2731_p7 = scmp.lt.s32.totalorder %s2725_s27, %s2725_s27 }
  0x15   :  { %p2732_p8 = por %p2731_p7, %p2730_p6 }
  0x17   :  { %p2733_p9 = pnand %p2732_p8, %p2726_p5 }
  0x19   :  { %2736 = shalt.err (!%p2733_p9)
}
  0x1a   :  { %84 = dma.hbm_to_vmem [thread:$0]  %s3447_s5, 2048, %s79_s21, [#allocation11], %s2901_s23, %s2901_s23, %s2902_s24  }
  0x1b   :  { %s2903_s30 = smov [#allocation13]   ;;  %s2904_s17 = smov [#allocation6]  }
  0x1c   :  { %s106_s16 = sshll.u32 %s2903_s30, 4  ;;  %s40_s18 = sshll.u32 %s2904_s17, 4  ;;  %s107_s16 = int_to_ptr.vmem [resolvable:$true] %s106_s16  ;;  %s41_s18 = int_to_ptr.vmem [resolvable:$true] %s40_s18 }
  0x1d   :  { %s2745_s2 = scalar_lea.vmem %s107_s16, 2048  ;;  %p2750_p11 = scmp.lt.s32.totalorder %s107_s16, %s107_s16 }
  0x1e   :  { %p2746_p10 = scmp.ne.s32.totalorder %s107_s16, %s2745_s2  ;;  %p2751_p12 = scmp.lt.s32.totalorder %s2745_s2, %s2745_s2 }
  0x20   :  { %p2752_p13 = por %p2751_p12, %p2750_p11 }
  0x22   :  { %p2753_p0 = pnand %p2752_p13, %p2746_p10 }
  0x24   :  { %2756 = shalt.err (!%p2753_p0)
}
  0x25   :  { %112 = dma.hbm_to_vmem [thread:$0]  %s3451_s9, 2048, %s107_s16, [#allocation14], %s2901_s23, %s2901_s23, %s2902_s24  }
  0x26   :  { %s2905_s5 = smov [#allocation2]   ;;  %s2773_s25 = scalar_lea.vmem %s41_s18, 2048 }
  0x27   :  { %34 = dma.hbm_to_smem %s3442_s0, 16, %s2905_s5, [#allocation5]  }
  0x28   :  { %p2774_p1 = scmp.ne.s32.totalorder %s41_s18, %s2773_s25  ;;  %p2778_p2 = scmp.lt.s32.totalorder %s41_s18, %s41_s18 }
  0x29   :  { %p2779_p3 = scmp.lt.s32.totalorder %s2773_s25, %s2773_s25 }
  0x2b   :  { %p2780_p4 = por %p2779_p3, %p2778_p2 }
  0x2d   :  { %p2781_p5 = pnand %p2780_p4, %p2774_p1 }
  0x2f   :  { %2784 = shalt.err (!%p2781_p5)
}
  0x30   :  { %46 = dma.hbm_to_vmem [thread:$0]  %s3443_s1, 2048, %s41_s18, [#allocation3], %s2901_s23, %s2901_s23, %s2902_s24  }
  0x31   :  { %s2906_s9 = smov [#allocation9]   ;;  %s2907_s29 = smov [#allocation12]  }
  0x32   :  { %s64_s28 = sshll.u32 %s2906_s9, 4  ;;  %s92_s0 = sshll.u32 %s2907_s29, 4  ;;  %s65_s28 = int_to_ptr.vmem [resolvable:$true] %s64_s28  ;;  %s93_s0 = int_to_ptr.vmem [resolvable:$true] %s92_s0 }
  0x33   :  { %s2793_s30 = scalar_lea.vmem %s65_s28, 2048  ;;  %p2798_p7 = scmp.lt.s32.totalorder %s65_s28, %s65_s28 }
  0x34   :  { %p2794_p6 = scmp.ne.s32.totalorder %s65_s28, %s2793_s30  ;;  %p2799_p8 = scmp.lt.s32.totalorder %s2793_s30, %s2793_s30 }
  0x36   :  { %p2800_p9 = por %p2799_p8, %p2798_p7 }
  0x38   :  { %p2801_p10 = pnand %p2800_p9, %p2794_p6 }
  0x3a   :  { %2804 = shalt.err (!%p2801_p10)
}
  0x3b   :  { %70 = dma.hbm_to_vmem [thread:$0]  %s3445_s3, 2048, %s65_s28, [#allocation8], %s2901_s23, %s2901_s23, %s2902_s24  }
  0x3c   :  { %s2813_s1 = scalar_lea.vmem %s93_s0, 2048  ;;  %p2818_p12 = scmp.lt.s32.totalorder %s93_s0, %s93_s0 }
  0x3d   :  { %p2814_p11 = scmp.ne.s32.totalorder %s93_s0, %s2813_s1  ;;  %p2819_p13 = scmp.lt.s32.totalorder %s2813_s1, %s2813_s1 }
  0x3f   :  { %p2820_p0 = por %p2819_p13, %p2818_p12 }
  0x41   :  { %p2821_p1 = pnand %p2820_p0, %p2814_p11 }
  0x43   :  { %2824 = shalt.err (!%p2821_p1)
}
  0x44   :  { %98 = dma.hbm_to_vmem [thread:$0]  %s3449_s7, 2048, %s93_s0, [#allocation11], %s2901_s23, %s2901_s23, %s2902_s24  }
  0x45   :  { %s2908_s19 = smov [#allocation15]   ;;  %s2909_s5 = smov [#allocation16]  }
  0x46   :  { %s120_s20 = sshll.u32 %s2908_s19, 4  ;;  %s134_s3 = sshll.u32 %s2909_s5, 4  ;;  %s121_s20 = int_to_ptr.vmem [resolvable:$true] %s120_s20  ;;  %s135_s3 = int_to_ptr.vmem [resolvable:$true] %s134_s3 }
  0x47   :  { %s2833_s21 = scalar_lea.vmem %s121_s20, 2048  ;;  %p2838_p3 = scmp.lt.s32.totalorder %s121_s20, %s121_s20 }
  0x48   :  { %p2834_p2 = scmp.ne.s32.totalorder %s121_s20, %s2833_s21  ;;  %p2839_p4 = scmp.lt.s32.totalorder %s2833_s21, %s2833_s21 }
  0x4a   :  { %p2840_p5 = por %p2839_p4, %p2838_p3 }
  0x4c   :  { %p2841_p6 = pnand %p2840_p5, %p2834_p2 }
  0x4e   :  { %2844 = shalt.err (!%p2841_p6)
}
  0x4f   :  { %126 = dma.hbm_to_vmem [thread:$0]  %s3453_s11, 2048, %s121_s20, [#allocation14], %s2901_s23, %s2901_s23, %s2902_s24  }
  0x50   :  { %s2853_s7 = scalar_lea.vmem %s135_s3, 2048  ;;  %p2858_p8 = scmp.lt.s32.totalorder %s135_s3, %s135_s3 }
  0x51   :  { %p2854_p7 = scmp.ne.s32.totalorder %s135_s3, %s2853_s7  ;;  %p2859_p9 = scmp.lt.s32.totalorder %s2853_s7, %s2853_s7 }
  0x53   :  { %p2860_p10 = por %p2859_p9, %p2858_p8 }
  0x55   :  { %p2861_p11 = pnand %p2860_p10, %p2854_p7 }
  0x57   :  { %2864 = shalt.err (!%p2861_p11)
}
  0x58   :  { %140 = dma.hbm_to_vmem [thread:$0]  %s3455_s13, 2048, %s135_s3, [#allocation17], %s2901_s23, %s2901_s23, %s2902_s24  }
  0x59   :  { %2885 = dma.done.wait [#allocation5], 16  }
  0x5a   :  { %2886 = vsyncadd [#allocation5], 4294967280 }
  0x5b   :  { %2887 = dma.done.wait [#allocation3], 2048  }
  0x5c   :  { %2888 = vsyncadd [#allocation3], 4294965248 }
  0x5d   :  { %2889 = dma.done.wait [#allocation8], 4096  }
  0x5e   :  { %2890 = vsyncadd [#allocation8], 4294963200 }
  0x5f   :  { %2891 = dma.done.wait [#allocation11], 4096  }
  0x60   :  { %2892 = vsyncadd [#allocation11], 4294963200 }
  0x61   :  { %2893 = dma.done.wait [#allocation14], 4096  }
  0x62   :  { %2894 = vsyncadd [#allocation14], 4294963200 }
  0x63   :  { %2895 = dma.done.wait [#allocation17], 2048  }
  0x64   :  { %2896 = vsyncadd [#allocation17], 4294965248 }
  0x65   :  { %170 = sfence }
  0x66   :  { %v3042_v0 = vld [vmem:[#allocation7 + $0x78] sm:$0xff]  ;;  %v3044_v1 = vld [vmem:[#allocation7 + $0x70] sm:$0xff]  ;;  %v3048_v2 = vld [vmem:[#allocation7 + $0x68] sm:$0xff]  ;;  %s237_s11 = sld [smem:[#allocation2]] }
  0x67   :  { %2133 = vmatprep.subr.mxu0 %v3042_v0  ;;  %v3052_v3 = vld [vmem:[#allocation7 + $0x60] sm:$0xff]  ;;  %v3058_v5 = vld [vmem:[#allocation7 + $0x58] sm:$0xff]  ;;  %v3063_v6 = vld [vmem:[#allocation7 + $0x50] sm:$0xff] }
  0x68   :  { %2134 = vmatpush3.msra.mxu0 %v3042_v0  ;;  %v3055_v4 = vld [vmem:[#allocation6] sm:$0xff]  ;;  %v3067_v7 = vld [vmem:[#allocation7 + $0x48] sm:$0xff]  ;;  %v218_v8 = vld [vmem:[#allocation9 + $0x78] sm:$0xff] }
  0x69   :  { %2135 = vmatprep.subr.mxu0 %v3044_v1  ;;  %2165 = vmatprep.mubr.f32.mxu0 %v3055_v4  ;;  %v217_v9 = vld [vmem:[#allocation9 + $0x70] sm:$0xff]  ;;  %v3071_v10 = vld [vmem:[#allocation7 + $0x40] sm:$0xff]  ;;  %v216_v11 = vld [vmem:[#allocation9 + $0x68] sm:$0xff] }
  0x6a   :  { %2136 = vmatpush3.msra.mxu0 %v3044_v1  ;;  %2189 = vmatprep.subr.mxu1 %v218_v8  ;;  %v3075_v12 = vld [vmem:[#allocation7 + $0x38] sm:$0xff]  ;;  %v215_v13 = vld [vmem:[#allocation9 + $0x60] sm:$0xff]  ;;  %v3079_v14 = vld [vmem:[#allocation7 + $0x30] sm:$0xff] }
  0x6b   :  { %2137 = vmatprep.subr.mxu0 %v3048_v2  ;;  %2190 = vmatpush3.msra.mxu1 %v218_v8  ;;  %v214_v15 = vld [vmem:[#allocation9 + $0x58] sm:$0xff]  ;;  %v3083_v16 = vld [vmem:[#allocation7 + $0x28] sm:$0xff]  ;;  %v213_v17 = vld [vmem:[#allocation9 + $0x50] sm:$0xff] }
  0x6c   :  { %2138 = vmatpush3.msra.mxu0 %v3048_v2  ;;  %2191 = vmatprep.subr.mxu1 %v217_v9  ;;  %v3087_v18 = vld [vmem:[#allocation7 + $0x20] sm:$0xff]  ;;  %v212_v19 = vld [vmem:[#allocation9 + $0x48] sm:$0xff]  ;;  %v3091_v20 = vld [vmem:[#allocation7 + $0x18] sm:$0xff]  ;;  %s383_s13 = sadd.f32 1.0, %s237_s11 }
  0x6d   :  { %2139 = vmatprep.subr.mxu0 %v3052_v3  ;;  %2192 = vmatpush3.msra.mxu1 %v217_v9  ;;  %v211_v21 = vld [vmem:[#allocation9 + $0x40] sm:$0xff]  ;;  %v3095_v22 = vld [vmem:[#allocation7 + $0x10] sm:$0xff]  ;;  %v210_v23 = vld [vmem:[#allocation9 + $0x38] sm:$0xff] }
  0x6e   :  { %2140 = vmatpush3.msra.mxu0 %v3052_v3  ;;  %2193 = vmatprep.subr.mxu1 %v216_v11  ;;  %v3099_v24 = vld [vmem:[#allocation7 + $0x8] sm:$0xff]  ;;  %v209_v25 = vld [vmem:[#allocation9 + $0x30] sm:$0xff]  ;;  %v3103_v26 = vld [vmem:[#allocation7] sm:$0xff]  ;;  %v384_v60 = vstv %s383_s13 }
  0x6f   :  { %2141 = vmatprep.subr.mxu0 %v3058_v5  ;;  %2194 = vmatpush3.msra.mxu1 %v216_v11  ;;  %v208_v27 = vld [vmem:[#allocation9 + $0x28] sm:$0xff]  ;;  %v207_v29 = vld [vmem:[#allocation9 + $0x20] sm:$0xff]  ;;  %v3110_v30 = vld [vmem:[#allocation6 + $0x10] sm:$0xff]  ;;  %v385_v61 = vmul.f32 %v384_v60, %v3103_v26  ;;  %v386_v63 = vmul.f32 %v384_v60, %v3099_v24  ;;  %v387_v11 = vmul.f32 %v384_v60, %v3095_v22 }
  0x70   :  { %2142 = vmatpush3.msra.mxu0 %v3058_v5  ;;  %2195 = vmatprep.subr.mxu1 %v215_v13  ;;  %v3107_v28 = vld [vmem:[#allocation6 + $0x8] sm:$0xff]  ;;  %v206_v31 = vld [vmem:[#allocation9 + $0x18] sm:$0xff]  ;;  %v3117_v33 = vld [vmem:[#allocation6 + $0x20] sm:$0xff] }
  0x71   :  { %2143 = vmatprep.subr.mxu0 %v3063_v6  ;;  %2196 = vmatpush3.msra.mxu1 %v215_v13  ;;  %v3115_v32 = vld [vmem:[#allocation6 + $0x18] sm:$0xff]  ;;  %v3121_v34 = vld [vmem:[#allocation6 + $0x28] sm:$0xff]  ;;  %v3123_v35 = vld [vmem:[#allocation6 + $0x30] sm:$0xff] }
  0x72   :  { %2144 = vmatpush3.msra.mxu0 %v3063_v6  ;;  %2197 = vmatprep.subr.mxu1 %v214_v15  ;;  %v3127_v36 = vld [vmem:[#allocation6 + $0x38] sm:$0xff]  ;;  %v3129_v37 = vld [vmem:[#allocation6 + $0x40] sm:$0xff]  ;;  %v3133_v38 = vld [vmem:[#allocation6 + $0x48] sm:$0xff] }
  0x73   :  { %2145 = vmatprep.subr.mxu0 %v3067_v7  ;;  %2198 = vmatpush3.msra.mxu1 %v214_v15  ;;  %v3135_v39 = vld [vmem:[#allocation6 + $0x50] sm:$0xff]  ;;  %v3139_v40 = vld [vmem:[#allocation6 + $0x58] sm:$0xff]  ;;  %v3141_v41 = vld [vmem:[#allocation6 + $0x60] sm:$0xff] }
  0x74   :  { %2146 = vmatpush3.msra.mxu0 %v3067_v7  ;;  %2199 = vmatprep.subr.mxu1 %v213_v17  ;;  %v3145_v42 = vld [vmem:[#allocation6 + $0x68] sm:$0xff]  ;;  %v3147_v43 = vld [vmem:[#allocation6 + $0x70] sm:$0xff]  ;;  %v3151_v44 = vld [vmem:[#allocation6 + $0x78] sm:$0xff] }
  0x75   :  { %2147 = vmatprep.subr.mxu0 %v3071_v10  ;;  %2200 = vmatpush3.msra.mxu1 %v213_v17  ;;  %v205_v45 = vld [vmem:[#allocation9 + $0x10] sm:$0xff]  ;;  %v204_v46 = vld [vmem:[#allocation9 + $0x8] sm:$0xff]  ;;  %v203_v47 = vld [vmem:[#allocation9] sm:$0xff]  ;;  %v388_v17 = vmul.f32 %v384_v60, %v3091_v20 }
  0x76   :  { %2148 = vmatpush3.msra.mxu0 %v3071_v10  ;;  %2201 = vmatprep.subr.mxu1 %v212_v19  ;;  %v235_v48 = vld [vmem:[#allocation10 + $0x78] sm:$0xff]  ;;  %v234_v49 = vld [vmem:[#allocation10 + $0x70] sm:$0xff]  ;;  %v233_v50 = vld [vmem:[#allocation10 + $0x68] sm:$0xff] }
  0x77   :  { %2149 = vmatprep.subr.mxu0 %v3075_v12  ;;  %2202 = vmatpush3.msra.mxu1 %v212_v19  ;;  %v232_v51 = vld [vmem:[#allocation10 + $0x60] sm:$0xff]  ;;  %v231_v52 = vld [vmem:[#allocation10 + $0x58] sm:$0xff]  ;;  %v230_v53 = vld [vmem:[#allocation10 + $0x50] sm:$0xff] }
  0x78   :  { %2150 = vmatpush3.msra.mxu0 %v3075_v12  ;;  %2203 = vmatprep.subr.mxu1 %v211_v21  ;;  %v229_v54 = vld [vmem:[#allocation10 + $0x48] sm:$0xff]  ;;  %v228_v55 = vld [vmem:[#allocation10 + $0x40] sm:$0xff]  ;;  %v227_v56 = vld [vmem:[#allocation10 + $0x38] sm:$0xff] }
  0x79   :  { %2151 = vmatprep.subr.mxu0 %v3079_v14  ;;  %2204 = vmatpush3.msra.mxu1 %v211_v21  ;;  %v226_v57 = vld [vmem:[#allocation10 + $0x30] sm:$0xff]  ;;  %v225_v58 = vld [vmem:[#allocation10 + $0x28] sm:$0xff]  ;;  %v224_v59 = vld [vmem:[#allocation10 + $0x20] sm:$0xff] }
  0x7a   :  { %2152 = vmatpush3.msra.mxu0 %v3079_v14  ;;  %2205 = vmatprep.subr.mxu1 %v210_v23 }
  0x7b   :  { %2153 = vmatprep.subr.mxu0 %v3083_v16  ;;  %2206 = vmatpush3.msra.mxu1 %v210_v23  ;;  %v389_v23 = vmul.f32 %v384_v60, %v3087_v18 }
  0x7c   :  { %2154 = vmatpush3.msra.mxu0 %v3083_v16  ;;  %2207 = vmatprep.subr.mxu1 %v209_v25 }
  0x7d   :  { %2155 = vmatprep.subr.mxu0 %v3087_v18  ;;  %2208 = vmatpush3.msra.mxu1 %v209_v25 }
  0x7e   :  { %2156 = vmatpush3.msra.mxu0 %v3087_v18  ;;  %2209 = vmatprep.subr.mxu1 %v208_v27  ;;  %v393_v18 = vmul.f32 %v384_v60, %v3071_v10  ;;  %v397_v10 = vmul.f32 %v384_v60, %v3052_v3  ;;  %v222_v3 = vld [vmem:[#allocation10 + $0x10] sm:$0xff] }
  0x7f   :  { %2157 = vmatprep.subr.mxu0 %v3091_v20  ;;  %2210 = vmatpush3.msra.mxu1 %v208_v27 }
  0x80   :  { %2158 = vmatpush3.msra.mxu0 %v3091_v20  ;;  %2211 = vmatprep.subr.mxu1 %v207_v29  ;;  %v392_v20 = vmul.f32 %v384_v60, %v3075_v12  ;;  %v396_v12 = vmul.f32 %v384_v60, %v3058_v5  ;;  %v400_v5 = vmul.f32 %v384_v60, %v3042_v0  ;;  %v1837_v0 = vld [vmem:[%s3446_s4] ss:$0 sm:$0xff] }
  0x81   :  { %2159 = vmatprep.subr.mxu0 %v3095_v22  ;;  %2212 = vmatpush3.msra.mxu1 %v207_v29 }
  0x82   :  { %2160 = vmatpush3.msra.mxu0 %v3095_v22  ;;  %2213 = vmatprep.subr.mxu1 %v206_v31  ;;  %v391_v22 = vmul.f32 %v384_v60, %v3079_v14  ;;  %v395_v14 = vmul.f32 %v384_v60, %v3063_v6  ;;  %v399_v6 = vmul.f32 %v384_v60, %v3044_v1  ;;  %v221_v1 = vld [vmem:[#allocation10 + $0x8] sm:$0xff] }
  0x83   :  { %2161 = vmatprep.subr.mxu0 %v3099_v24  ;;  %2214 = vmatpush3.msra.mxu1 %v206_v31 }
  0x84   :  { %2162 = vmatpush3.msra.mxu0 %v3099_v24  ;;  %2215 = vmatprep.subr.mxu1 %v205_v45 }
  0x85   :  { %2163 = vmatprep.subr.mxu0 %v3103_v26  ;;  %2216 = vmatpush3.msra.mxu1 %v205_v45 }
  0x86   :  { %2164 = vmatpush3.msra.mxu0 %v3103_v26  ;;  %2217 = vmatprep.subr.mxu1 %v204_v46  ;;  %v390_v26 = vmul.f32 %v384_v60, %v3083_v16  ;;  %v394_v16 = vmul.f32 %v384_v60, %v3067_v7  ;;  %v398_v7 = vmul.f32 %v384_v60, %v3048_v2  ;;  %v223_v2 = vld [vmem:[#allocation10 + $0x18] sm:$0xff] }
  0x87   :  { %2166 = vmatmul.mubr.f32.vlgmr.msra.gmra.mxu0 %v3107_v28  ;;  %2218 = vmatpush3.msra.mxu1 %v204_v46 }
  0x88   :  { %2168 = vmatprep.mubr.f32.mxu0 %v3110_v30  ;;  %2219 = vmatprep.subr.mxu1 %v203_v47 }
  0x89   :  { %2220 = vmatpush3.msra.mxu1 %v203_v47  ;;  %2245 = vmatprep.subr.mxu0 %v235_v48 }
  0x8a   :  { %2246 = vmatpush3.msra.mxu0 %v235_v48 }
  0x8b   :  { %2169 = vmatmul.mubr.f32.gmra.mxu0 %v3115_v32  ;;  %2247 = vmatprep.subr.mxu0 %v234_v49 }
  0x8c   :  { %2171 = vmatprep.mubr.f32.mxu0 %v3117_v33  ;;  %2248 = vmatpush3.msra.mxu0 %v234_v49 }
  0x8d   :  { %2249 = vmatprep.subr.mxu0 %v233_v50 }
  0x8e   :  { %2250 = vmatpush3.msra.mxu0 %v233_v50 }
  0x8f   :  { %2172 = vmatmul.mubr.f32.gmra.mxu0 %v3121_v34  ;;  %2251 = vmatprep.subr.mxu0 %v232_v51 }
  0x90   :  { %2174 = vmatprep.mubr.f32.mxu0 %v3123_v35  ;;  %2252 = vmatpush3.msra.mxu0 %v232_v51 }
  0x91   :  { %2253 = vmatprep.subr.mxu0 %v231_v52 }
  0x92   :  { %2254 = vmatpush3.msra.mxu0 %v231_v52 }
  0x93   :  { %2175 = vmatmul.mubr.f32.gmra.mxu0 %v3127_v36  ;;  %2255 = vmatprep.subr.mxu0 %v230_v53 }
  0x94   :  { %2177 = vmatprep.mubr.f32.mxu0 %v3129_v37  ;;  %2256 = vmatpush3.msra.mxu0 %v230_v53 }
  0x95   :  { %2257 = vmatprep.subr.mxu0 %v229_v54 }
  0x96   :  { %2258 = vmatpush3.msra.mxu0 %v229_v54 }
  0x97   :  { %2178 = vmatmul.mubr.f32.gmra.mxu0 %v3133_v38  ;;  %2259 = vmatprep.subr.mxu0 %v228_v55 }
  0x98   :  { %2180 = vmatprep.mubr.f32.mxu0 %v3135_v39  ;;  %2260 = vmatpush3.msra.mxu0 %v228_v55 }
  0x99   :  { %2261 = vmatprep.subr.mxu0 %v227_v56 }
  0x9a   :  { %2262 = vmatpush3.msra.mxu0 %v227_v56 }
  0x9b   :  { %2181 = vmatmul.mubr.f32.gmra.mxu0 %v3139_v40  ;;  %2263 = vmatprep.subr.mxu0 %v226_v57 }
  0x9c   :  { %2183 = vmatprep.mubr.f32.mxu0 %v3141_v41  ;;  %2264 = vmatpush3.msra.mxu0 %v226_v57 }
  0x9d   :  { %2265 = vmatprep.subr.mxu0 %v225_v58 }
  0x9e   :  { %2266 = vmatpush3.msra.mxu0 %v225_v58 }
  0x9f   :  { %2184 = vmatmul.mubr.f32.gmra.mxu0 %v3145_v42  ;;  %2267 = vmatprep.subr.mxu0 %v224_v59 }
  0xa0   :  { %2186 = vmatprep.mubr.f32.mxu0 %v3147_v43  ;;  %2268 = vmatpush3.msra.mxu0 %v224_v59 }
  0xa1   :  { %2269 = vmatprep.subr.mxu0 %v223_v2 }
  0xa2   :  { %2270 = vmatpush3.msra.mxu0 %v223_v2 }
  0xa3   :  { %2187 = vmatmul.mubr.f32.gmra.mxu0 %v3151_v44  ;;  %2271 = vmatprep.subr.mxu0 %v222_v3 }
  0xa4   :  { %2272 = vmatpush3.msra.mxu0 %v222_v3 }
  0xa5   :  { %2273 = vmatprep.subr.mxu0 %v221_v1 }
  0xa6   :  { %2274 = vmatpush3.msra.mxu0 %v221_v1 }
 0x147   :  { %v2167_v62 = vpop.f32.mrf.mxu0 }
 0x148   :  { %v402_v13 = vadd.f32 %v2167_v62, %v386_v63 }
 0x149   :  { %v304_v8 = vpop.f32.mrf.mxu0 }
 0x14a   :  { %v401_v9 = vadd.f32 %v385_v61, %v304_v8 }
 0x14b   :  { %v2170_v15 = vpop.f32.mrf.mxu0 }
 0x14c   :  { %2221 = vmatprep.mubr.f32.mxu1 %v401_v9  ;;  %v404_v25 = vadd.f32 %v2170_v15, %v388_v17 }
 0x14d   :  { %v314_v19 = vpop.f32.mrf.mxu0  ;;  %2222 = vmatmul.mubr.f32.vlgmr.msra.gmra.mxu1 %v402_v13 }
 0x14e   :  { %v403_v21 = vadd.f32 %v387_v11, %v314_v19  ;;  %v220_v11 = vld [vmem:[#allocation10] sm:$0xff] }
 0x14f   :  { %v2173_v27 = vpop.f32.mrf.mxu0  ;;  %2275 = vmatprep.subr.mxu0 %v220_v11 }
 0x150   :  { %2224 = vmatprep.mubr.f32.mxu1 %v403_v21  ;;  %v406_v31 = vadd.f32 %v2173_v27, %v390_v26  ;;  %2276 = vmatpush3.msra.mxu0 %v220_v11 }
 0x151   :  { %v324_v24 = vpop.f32.mrf.mxu0  ;;  %2225 = vmatmul.mubr.f32.gmra.mxu1 %v404_v25 }
 0x152   :  { %v405_v29 = vadd.f32 %v389_v23, %v324_v24 }
 0x153   :  { %v2176_v45 = vpop.f32.mrf.mxu0 }
 0x154   :  { %2227 = vmatprep.mubr.f32.mxu1 %v405_v29  ;;  %v408_v48 = vadd.f32 %v2176_v45, %v392_v20 }
 0x155   :  { %v334_v46 = vpop.f32.mrf.mxu0  ;;  %2228 = vmatmul.mubr.f32.gmra.mxu1 %v406_v31 }
 0x156   :  { %v407_v47 = vadd.f32 %v391_v22, %v334_v46 }
 0x157   :  { %v2179_v49 = vpop.f32.mrf.mxu0 }
 0x158   :  { %2230 = vmatprep.mubr.f32.mxu1 %v407_v47  ;;  %v410_v52 = vadd.f32 %v2179_v49, %v394_v16 }
 0x159   :  { %v344_v50 = vpop.f32.mrf.mxu0  ;;  %2231 = vmatmul.mubr.f32.gmra.mxu1 %v408_v48 }
 0x15a   :  { %v409_v51 = vadd.f32 %v393_v18, %v344_v50 }
 0x15b   :  { %v2182_v53 = vpop.f32.mrf.mxu0 }
 0x15c   :  { %2233 = vmatprep.mubr.f32.mxu1 %v409_v51  ;;  %v412_v56 = vadd.f32 %v2182_v53, %v396_v12 }
 0x15d   :  { %v354_v54 = vpop.f32.mrf.mxu0  ;;  %2234 = vmatmul.mubr.f32.gmra.mxu1 %v410_v52 }
 0x15e   :  { %v411_v55 = vadd.f32 %v395_v14, %v354_v54 }
 0x15f   :  { %v2185_v57 = vpop.f32.mrf.mxu0 }
 0x160   :  { %2236 = vmatprep.mubr.f32.mxu1 %v411_v55  ;;  %v414_v61 = vadd.f32 %v2185_v57, %v398_v7 }
 0x161   :  { %v364_v58 = vpop.f32.mrf.mxu0  ;;  %2237 = vmatmul.mubr.f32.gmra.mxu1 %v412_v56 }
 0x162   :  { %v413_v59 = vadd.f32 %v397_v10, %v364_v58 }
 0x163   :  { %v2188_v62 = vpop.f32.mrf.mxu0 }
 0x164   :  { %2239 = vmatprep.mubr.f32.mxu1 %v413_v59  ;;  %v416_v9 = vadd.f32 %v2188_v62, %v400_v5 }
 0x165   :  { %v374_v63 = vpop.f32.mrf.mxu0  ;;  %2240 = vmatmul.mubr.f32.gmra.mxu1 %v414_v61 }
 0x166   :  { %v415_v8 = vadd.f32 %v399_v6, %v374_v63 }
 0x168   :  { %2242 = vmatprep.mubr.f32.mxu1 %v415_v8 }
 0x169   :  { %2243 = vmatmul.mubr.f32.gmra.mxu1 %v416_v9 }
 0x16a   :  { %2333 = vmatprep.mubr.f32.mxu1 %v3055_v4 }
 0x20d   :  { %v2223_v60 = vpop.f32.mrf.mxu1 }
 0x20e   :  { %v495_v13 = vadd.f32 %v2223_v60, %v1837_v0  ;;  %v750_v60 = vld [vmem:[#allocation12 + $0x78] sm:$0xff] }
 0x20f   :  { %v489_v15 = vpop.f32.mrf.mxu1  ;;  %2357 = vmatprep.subr.mxu0 %v750_v60 }
 0x210   :  { %v490_v4 = vadd.f32 %v1837_v0, %v489_v15  ;;  %v569_v21 = vmax.f32 %v495_v13, 0.0  ;;  %v749_v13 = vld [vmem:[#allocation12 + $0x70] sm:$0xff]  ;;  %v748_v15 = vld [vmem:[#allocation12 + $0x68] sm:$0xff] }
 0x211   :  { %v2226_v17 = vpop.f32.mrf.mxu1 }
 0x212   :  { %v568_v19 = vmax.f32 %v490_v4, 0.0  ;;  %v505_v23 = vadd.f32 %v2226_v17, %v1837_v0  ;;  %v747_v4 = vld [vmem:[#allocation12 + $0x60] sm:$0xff]  ;;  %v746_v17 = vld [vmem:[#allocation12 + $0x58] sm:$0xff] }
 0x213   :  { %v499_v25 = vpop.f32.mrf.mxu1 }
 0x214   :  { %v500_v27 = vadd.f32 %v1837_v0, %v499_v25  ;;  %2277 = vmatprep.mubr.f32.mxu0 %v568_v19  ;;  %v571_v29 = vmax.f32 %v505_v23, 0.0  ;;  %v744_v19 = vld [vmem:[#allocation12 + $0x48] sm:$0xff]  ;;  %v742_v23 = vld [vmem:[#allocation12 + $0x38] sm:$0xff]  ;;  %v741_v25 = vld [vmem:[#allocation12 + $0x30] sm:$0xff] }
 0x215   :  { %v2229_v26 = vpop.f32.mrf.mxu1  ;;  %2278 = vmatmul.mubr.f32.vlgmr.msra.gmra.mxu0 %v569_v21  ;;  %v743_v21 = vld [vmem:[#allocation12 + $0x40] sm:$0xff] }
 0x216   :  { %v570_v24 = vmax.f32 %v500_v27, 0.0  ;;  %v515_v22 = vadd.f32 %v2229_v26, %v1837_v0  ;;  %2358 = vmatpush3.msra.mxu0 %v750_v60  ;;  %v740_v27 = vld [vmem:[#allocation12 + $0x28] sm:$0xff]  ;;  %v739_v26 = vld [vmem:[#allocation12 + $0x20] sm:$0xff] }
 0x217   :  { %v509_v31 = vpop.f32.mrf.mxu1  ;;  %2359 = vmatprep.subr.mxu0 %v749_v13 }
 0x218   :  { %v510_v45 = vadd.f32 %v1837_v0, %v509_v31  ;;  %2280 = vmatprep.mubr.f32.mxu0 %v570_v24  ;;  %v573_v47 = vmax.f32 %v515_v22, 0.0  ;;  %2360 = vmatpush3.msra.mxu0 %v749_v13  ;;  %v738_v24 = vld [vmem:[#allocation12 + $0x18] sm:$0xff] }
 0x219   :  { %v2232_v20 = vpop.f32.mrf.mxu1  ;;  %2281 = vmatmul.mubr.f32.gmra.mxu0 %v571_v29  ;;  %2361 = vmatprep.subr.mxu0 %v748_v15 }
 0x21a   :  { %v572_v46 = vmax.f32 %v510_v45, 0.0  ;;  %v525_v18 = vadd.f32 %v2232_v20, %v1837_v0  ;;  %2362 = vmatpush3.msra.mxu0 %v748_v15 }
 0x21b   :  { %v519_v48 = vpop.f32.mrf.mxu1  ;;  %2363 = vmatprep.subr.mxu0 %v747_v4 }
 0x21c   :  { %v520_v49 = vadd.f32 %v1837_v0, %v519_v48  ;;  %2283 = vmatprep.mubr.f32.mxu0 %v572_v46  ;;  %v575_v51 = vmax.f32 %v525_v18, 0.0  ;;  %2364 = vmatpush3.msra.mxu0 %v747_v4 }
 0x21d   :  { %v2235_v16 = vpop.f32.mrf.mxu1  ;;  %2284 = vmatmul.mubr.f32.gmra.mxu0 %v573_v47  ;;  %2365 = vmatprep.subr.mxu0 %v746_v17 }
 0x21e   :  { %v574_v50 = vmax.f32 %v520_v49, 0.0  ;;  %v535_v14 = vadd.f32 %v2235_v16, %v1837_v0  ;;  %2366 = vmatpush3.msra.mxu0 %v746_v17 }
 0x21f   :  { %v529_v52 = vpop.f32.mrf.mxu1 }
 0x220   :  { %v530_v53 = vadd.f32 %v1837_v0, %v529_v52  ;;  %2286 = vmatprep.mubr.f32.mxu0 %v574_v50  ;;  %v577_v55 = vmax.f32 %v535_v14, 0.0  ;;  %v1838_v52 = vld [vmem:[%s3448_s6] ss:$0 sm:$0xff]  ;;  %s1839_s6 = sld [smem:[#allocation2 + $0x1]] }
 0x221   :  { %v2238_v12 = vpop.f32.mrf.mxu1  ;;  %2287 = vmatmul.mubr.f32.gmra.mxu0 %v575_v51 }
 0x222   :  { %v576_v54 = vmax.f32 %v530_v53, 0.0  ;;  %v545_v10 = vadd.f32 %v2238_v12, %v1837_v0 }
 0x223   :  { %v539_v56 = vpop.f32.mrf.mxu1 }
 0x224   :  { %v540_v57 = vadd.f32 %v1837_v0, %v539_v56  ;;  %2289 = vmatprep.mubr.f32.mxu0 %v576_v54  ;;  %v579_v59 = vmax.f32 %v545_v10, 0.0 }
 0x225   :  { %v2241_v7 = vpop.f32.mrf.mxu1  ;;  %2290 = vmatmul.mubr.f32.gmra.mxu0 %v577_v55 }
 0x226   :  { %v578_v58 = vmax.f32 %v540_v57, 0.0  ;;  %v555_v6 = vadd.f32 %v2241_v7, %v1837_v0  ;;  %s915_s0 = sadd.f32 1.0, %s1839_s6 }
 0x227   :  { %v549_v61 = vpop.f32.mrf.mxu1 }
 0x228   :  { %v550_v62 = vadd.f32 %v1837_v0, %v549_v61  ;;  %2292 = vmatprep.mubr.f32.mxu0 %v578_v58  ;;  %v581_v8 = vmax.f32 %v555_v6, 0.0 }
 0x229   :  { %v2244_v5 = vpop.f32.mrf.mxu1  ;;  %2293 = vmatmul.mubr.f32.gmra.mxu0 %v579_v59 }
 0x22a   :  { %v580_v63 = vmax.f32 %v550_v62, 0.0  ;;  %v565_v9 = vadd.f32 %v2244_v5, %v1837_v0 }
 0x22b   :  { %v559_v2 = vpop.f32.mrf.mxu1 }
 0x22c   :  { %v560_v3 = vadd.f32 %v1837_v0, %v559_v2  ;;  %2295 = vmatprep.mubr.f32.mxu0 %v580_v63  ;;  %v583_v11 = vmax.f32 %v565_v9, 0.0  ;;  %v745_v0 = vld [vmem:[#allocation12 + $0x50] sm:$0xff] }
 0x22d   :  { %2296 = vmatmul.mubr.f32.gmra.mxu0 %v581_v8  ;;  %2367 = vmatprep.subr.mxu0 %v745_v0 }
 0x22e   :  { %v582_v1 = vmax.f32 %v560_v3, 0.0  ;;  %2368 = vmatpush3.msra.mxu0 %v745_v0  ;;  %v916_v3 = vstv %s915_s0 }
 0x22f   :  { %2369 = vmatprep.subr.mxu0 %v744_v19 }
 0x230   :  { %2298 = vmatprep.mubr.f32.mxu0 %v582_v1  ;;  %2370 = vmatpush3.msra.mxu0 %v744_v19 }
 0x231   :  { %2299 = vmatmul.mubr.f32.gmra.mxu0 %v583_v11  ;;  %2371 = vmatprep.subr.mxu0 %v743_v21 }
 0x232   :  { %2372 = vmatpush3.msra.mxu0 %v743_v21 }
 0x233   :  { %2373 = vmatprep.subr.mxu0 %v742_v23 }
 0x234   :  { %2374 = vmatpush3.msra.mxu0 %v742_v23 }
 0x235   :  { %2375 = vmatprep.subr.mxu0 %v741_v25 }
 0x236   :  { %2376 = vmatpush3.msra.mxu0 %v741_v25 }
 0x237   :  { %2377 = vmatprep.subr.mxu0 %v740_v27 }
 0x238   :  { %2378 = vmatpush3.msra.mxu0 %v740_v27 }
 0x239   :  { %2379 = vmatprep.subr.mxu0 %v739_v26 }
 0x23a   :  { %2380 = vmatpush3.msra.mxu0 %v739_v26 }
 0x23b   :  { %2381 = vmatprep.subr.mxu0 %v738_v24 }
 0x23c   :  { %2382 = vmatpush3.msra.mxu0 %v738_v24 }
 0x2d5   :  { %v2279_v29 = vpop.f32.mrf.mxu0 }
 0x2d6   :  { %v3231_v9 = vadd.f32 %v2279_v29, %v1838_v52 }
 0x2d7   :  { %v656_v22 = vpop.f32.mrf.mxu0 }
 0x2d8   :  { %v3235_v2 = vadd.f32 %v1838_v52, %v656_v22  ;;  %v918_v60 = vmul.f32 %v916_v3, %v3231_v9 }
 0x2d9   :  { %v2282_v31 = vpop.f32.mrf.mxu0 }
 0x2da   :  { %v3223_v63 = vadd.f32 %v2282_v31, %v1838_v52  ;;  %v917_v11 = vmul.f32 %v916_v3, %v3235_v2 }
 0x2db   :  { %v666_v45 = vpop.f32.mrf.mxu0 }
 0x2dc   :  { %v3227_v8 = vadd.f32 %v1838_v52, %v666_v45  ;;  %v920_v19 = vmul.f32 %v916_v3, %v3223_v63 }
 0x2dd   :  { %v2285_v20 = vpop.f32.mrf.mxu0 }
 0x2de   :  { %v3215_v62 = vadd.f32 %v2285_v20, %v1838_v52  ;;  %v919_v0 = vmul.f32 %v916_v3, %v3227_v8 }
 0x2df   :  { %v676_v46 = vpop.f32.mrf.mxu0 }
 0x2e0   :  { %v3219_v5 = vadd.f32 %v1838_v52, %v676_v46  ;;  %v922_v24 = vmul.f32 %v916_v3, %v3215_v62 }
 0x2e1   :  { %v2288_v47 = vpop.f32.mrf.mxu0 }
 0x2e2   :  { %v3207_v6 = vadd.f32 %v2288_v47, %v1838_v52  ;;  %v921_v26 = vmul.f32 %v916_v3, %v3219_v5 }
 0x2e3   :  { %v686_v18 = vpop.f32.mrf.mxu0 }
 0x2e4   :  { %v3211_v61 = vadd.f32 %v1838_v52, %v686_v18  ;;  %v924_v46 = vmul.f32 %v916_v3, %v3207_v6 }
 0x2e5   :  { %v2291_v48 = vpop.f32.mrf.mxu0 }
 0x2e6   :  { %v3199_v58 = vadd.f32 %v2291_v48, %v1838_v52  ;;  %v923_v20 = vmul.f32 %v916_v3, %v3211_v61 }
 0x2e7   :  { %v696_v49 = vpop.f32.mrf.mxu0 }
 0x2e8   :  { %v3203_v59 = vadd.f32 %v1838_v52, %v696_v49 }
 0x2e9   :  { %v2294_v16 = vpop.f32.mrf.mxu0 }
 0x2ea   :  { %v3191_v57 = vadd.f32 %v2294_v16, %v1838_v52  ;;  %v925_v16 = vmul.f32 %v916_v3, %v3203_v59 }
 0x2eb   :  { %v706_v50 = vpop.f32.mrf.mxu0 }
 0x2ec   :  { %v3195_v7 = vadd.f32 %v1838_v52, %v706_v50  ;;  %v926_v50 = vmul.f32 %v916_v3, %v3199_v58 }
 0x2ed   :  { %v2297_v51 = vpop.f32.mrf.mxu0 }
 0x2ee   :  { %v3183_v10 = vadd.f32 %v2297_v51, %v1838_v52 }
 0x2ef   :  { %v716_v14 = vpop.f32.mrf.mxu0 }
 0x2f0   :  { %v3187_v56 = vadd.f32 %v1838_v52, %v716_v14 }
 0x2f1   :  { %v2300_v53 = vpop.f32.mrf.mxu0 }
 0x2f2   :  { %v3177_v12 = vadd.f32 %v2300_v53, %v1838_v52 }
 0x2f3   :  { %v726_v54 = vpop.f32.mrf.mxu0 }
 0x2f4   :  { %v3179_v55 = vadd.f32 %v1838_v52, %v726_v54  ;;  %2301 = vmatprep.subr.mxu1 %v3177_v12  ;;  %v927_v54 = vmul.f32 %v916_v3, %v3195_v7 }
 0x2f5   :  { %2302 = vmatpush3.msra.mxu1 %v3177_v12 }
 0x2f6   :  { %2303 = vmatprep.subr.mxu1 %v3179_v55 }
 0x2f7   :  { %2304 = vmatpush3.msra.mxu1 %v3179_v55 }
 0x2f8   :  { %2305 = vmatprep.subr.mxu1 %v3183_v10 }
 0x2f9   :  { %2306 = vmatpush3.msra.mxu1 %v3183_v10 }
 0x2fa   :  { %2307 = vmatprep.subr.mxu1 %v3187_v56 }
 0x2fb   :  { %2308 = vmatpush3.msra.mxu1 %v3187_v56 }
 0x2fc   :  { %2309 = vmatprep.subr.mxu1 %v3191_v57 }
 0x2fd   :  { %2310 = vmatpush3.msra.mxu1 %v3191_v57 }
 0x2fe   :  { %2311 = vmatprep.subr.mxu1 %v3195_v7 }
 0x2ff   :  { %2312 = vmatpush3.msra.mxu1 %v3195_v7  ;;  %v931_v7 = vmul.f32 %v916_v3, %v3179_v55  ;;  %v752_v55 = vld [vmem:[#allocation13] sm:$0xff] }
 0x300   :  { %2313 = vmatprep.subr.mxu1 %v3199_v58 }
 0x301   :  { %2314 = vmatpush3.msra.mxu1 %v3199_v58  ;;  %v930_v58 = vmul.f32 %v916_v3, %v3183_v10  ;;  %v754_v10 = vld [vmem:[#allocation13 + $0x10] sm:$0xff] }
 0x302   :  { %2315 = vmatprep.subr.mxu1 %v3203_v59 }
 0x303   :  { %2316 = vmatpush3.msra.mxu1 %v3203_v59  ;;  %v929_v59 = vmul.f32 %v916_v3, %v3187_v56  ;;  %v755_v56 = vld [vmem:[#allocation13 + $0x18] sm:$0xff] }
 0x304   :  { %2317 = vmatprep.subr.mxu1 %v3207_v6 }
 0x305   :  { %2318 = vmatpush3.msra.mxu1 %v3207_v6  ;;  %v928_v6 = vmul.f32 %v916_v3, %v3191_v57  ;;  %v932_v57 = vmul.f32 %v916_v3, %v3177_v12  ;;  %v1840_v12 = vld [vmem:[%s3450_s8] ss:$0 sm:$0xff] }
 0x306   :  { %2319 = vmatprep.subr.mxu1 %v3211_v61 }
 0x307   :  { %2320 = vmatpush3.msra.mxu1 %v3211_v61 }
 0x308   :  { %2321 = vmatprep.subr.mxu1 %v3215_v62 }
 0x309   :  { %2322 = vmatpush3.msra.mxu1 %v3215_v62 }
 0x30a   :  { %2323 = vmatprep.subr.mxu1 %v3219_v5 }
 0x30b   :  { %2324 = vmatpush3.msra.mxu1 %v3219_v5 }
 0x30c   :  { %2325 = vmatprep.subr.mxu1 %v3223_v63 }
 0x30d   :  { %2326 = vmatpush3.msra.mxu1 %v3223_v63 }
 0x30e   :  { %2327 = vmatprep.subr.mxu1 %v3227_v8 }
 0x30f   :  { %2328 = vmatpush3.msra.mxu1 %v3227_v8 }
 0x310   :  { %2329 = vmatprep.subr.mxu1 %v3231_v9 }
 0x311   :  { %2330 = vmatpush3.msra.mxu1 %v3231_v9 }
 0x312   :  { %2331 = vmatprep.subr.mxu1 %v3235_v2 }
 0x313   :  { %2332 = vmatpush3.msra.mxu1 %v3235_v2 }
 0x314   :  { %2334 = vmatmul.mubr.f32.vlgmr.msra.gmra.mxu1 %v3107_v28  ;;  %v737_v28 = vld [vmem:[#allocation12 + $0x10] sm:$0xff] }
 0x315   :  { %2336 = vmatprep.mubr.f32.mxu1 %v3110_v30  ;;  %2383 = vmatprep.subr.mxu0 %v737_v28  ;;  %v736_v30 = vld [vmem:[#allocation12 + $0x8] sm:$0xff] }
 0x316   :  { %2384 = vmatpush3.msra.mxu0 %v737_v28 }
 0x317   :  { %2385 = vmatprep.subr.mxu0 %v736_v30 }
 0x318   :  { %2337 = vmatmul.mubr.f32.gmra.mxu1 %v3115_v32  ;;  %2386 = vmatpush3.msra.mxu0 %v736_v30  ;;  %v735_v32 = vld [vmem:[#allocation12] sm:$0xff] }
 0x319   :  { %2339 = vmatprep.mubr.f32.mxu1 %v3117_v33  ;;  %2387 = vmatprep.subr.mxu0 %v735_v32  ;;  %v767_v33 = vld [vmem:[#allocation13 + $0x78] sm:$0xff] }
 0x31a   :  { %2388 = vmatpush3.msra.mxu0 %v735_v32  ;;  %2413 = vmatprep.subr.mxu1 %v767_v33 }
 0x31b   :  { %2414 = vmatpush3.msra.mxu1 %v767_v33 }
 0x31c   :  { %2340 = vmatmul.mubr.f32.gmra.mxu1 %v3121_v34  ;;  %v766_v34 = vld [vmem:[#allocation13 + $0x70] sm:$0xff] }
 0x31d   :  { %2342 = vmatprep.mubr.f32.mxu1 %v3123_v35  ;;  %v765_v35 = vld [vmem:[#allocation13 + $0x68] sm:$0xff]  ;;  %2415 = vmatprep.subr.mxu1 %v766_v34 }
 0x31e   :  { %2416 = vmatpush3.msra.mxu1 %v766_v34  ;;  %v2681_v34 = vld [vmem:[#allocation6] sm:$0xff] }
 0x31f   :  { %2417 = vmatprep.subr.mxu1 %v765_v35 }
 0x320   :  { %2343 = vmatmul.mubr.f32.gmra.mxu1 %v3127_v36  ;;  %v764_v36 = vld [vmem:[#allocation13 + $0x60] sm:$0xff] }
 0x321   :  { %2345 = vmatprep.mubr.f32.mxu1 %v3129_v37  ;;  %2418 = vmatpush3.msra.mxu1 %v765_v35  ;;  %v763_v37 = vld [vmem:[#allocation13 + $0x58] sm:$0xff]  ;;  %v753_v35 = vld [vmem:[#allocation13 + $0x8] sm:$0xff] }
 0x322   :  { %2419 = vmatprep.subr.mxu1 %v764_v36 }
 0x323   :  { %2420 = vmatpush3.msra.mxu1 %v764_v36 }
 0x324   :  { %2346 = vmatmul.mubr.f32.gmra.mxu1 %v3133_v38  ;;  %v762_v38 = vld [vmem:[#allocation13 + $0x50] sm:$0xff]  ;;  %2421 = vmatprep.subr.mxu1 %v763_v37 }
 0x325   :  { %2348 = vmatprep.mubr.f32.mxu1 %v3135_v39  ;;  %2422 = vmatpush3.msra.mxu1 %v763_v37  ;;  %v761_v39 = vld [vmem:[#allocation13 + $0x48] sm:$0xff] }
 0x326   :  { %2423 = vmatprep.subr.mxu1 %v762_v38 }
 0x327   :  { %2424 = vmatpush3.msra.mxu1 %v762_v38 }
 0x328   :  { %2349 = vmatmul.mubr.f32.gmra.mxu1 %v3139_v40  ;;  %v760_v40 = vld [vmem:[#allocation13 + $0x40] sm:$0xff]  ;;  %2425 = vmatprep.subr.mxu1 %v761_v39 }
 0x329   :  { %2351 = vmatprep.mubr.f32.mxu1 %v3141_v41  ;;  %2426 = vmatpush3.msra.mxu1 %v761_v39  ;;  %v759_v41 = vld [vmem:[#allocation13 + $0x38] sm:$0xff] }
 0x32a   :  { %2427 = vmatprep.subr.mxu1 %v760_v40 }
 0x32b   :  { %2428 = vmatpush3.msra.mxu1 %v760_v40 }
 0x32c   :  { %2352 = vmatmul.mubr.f32.gmra.mxu1 %v3145_v42  ;;  %v758_v42 = vld [vmem:[#allocation13 + $0x30] sm:$0xff]  ;;  %2429 = vmatprep.subr.mxu1 %v759_v41 }
 0x32d   :  { %2354 = vmatprep.mubr.f32.mxu1 %v3147_v43  ;;  %2430 = vmatpush3.msra.mxu1 %v759_v41  ;;  %v757_v43 = vld [vmem:[#allocation13 + $0x28] sm:$0xff] }
 0x32e   :  { %2431 = vmatprep.subr.mxu1 %v758_v42 }
 0x32f   :  { %2432 = vmatpush3.msra.mxu1 %v758_v42 }
 0x330   :  { %2355 = vmatmul.mubr.f32.gmra.mxu1 %v3151_v44  ;;  %v756_v44 = vld [vmem:[#allocation13 + $0x20] sm:$0xff]  ;;  %2433 = vmatprep.subr.mxu1 %v757_v43 }
 0x331   :  { %2434 = vmatpush3.msra.mxu1 %v757_v43 }
 0x332   :  { %2435 = vmatprep.subr.mxu1 %v756_v44 }
 0x333   :  { %2436 = vmatpush3.msra.mxu1 %v756_v44 }
 0x334   :  { %2437 = vmatprep.subr.mxu1 %v755_v56 }
 0x335   :  { %2438 = vmatpush3.msra.mxu1 %v755_v56  ;;  %v1271_v56 = vld [vmem:[#allocation15 + $0x20] sm:$0xff] }
 0x336   :  { %2439 = vmatprep.subr.mxu1 %v754_v10 }
 0x337   :  { %2440 = vmatpush3.msra.mxu1 %v754_v10  ;;  %v1270_v10 = vld [vmem:[#allocation15 + $0x18] sm:$0xff] }
 0x338   :  { %2441 = vmatprep.subr.mxu1 %v753_v35 }
 0x339   :  { %2442 = vmatpush3.msra.mxu1 %v753_v35 }
 0x33a   :  { %2443 = vmatprep.subr.mxu1 %v752_v55 }
 0x33b   :  { %2444 = vmatpush3.msra.mxu1 %v752_v55 }
 0x3d4   :  { %v2335_v1 = vpop.f32.mrf.mxu1 }
 0x3d5   :  { %v934_v4 = vadd.f32 %v2335_v1, %v918_v60 }
 0x3d6   :  { %v836_v13 = vpop.f32.mrf.mxu1 }
 0x3d7   :  { %v933_v15 = vadd.f32 %v917_v11, %v836_v13 }
 0x3d8   :  { %v2338_v17 = vpop.f32.mrf.mxu1 }
 0x3d9   :  { %2389 = vmatprep.mubr.f32.mxu0 %v933_v15  ;;  %v936_v25 = vadd.f32 %v2338_v17, %v920_v19 }
 0x3da   :  { %v846_v21 = vpop.f32.mrf.mxu1  ;;  %2390 = vmatmul.mubr.f32.vlgmr.msra.gmra.mxu0 %v934_v4 }
 0x3db   :  { %v935_v23 = vadd.f32 %v919_v0, %v846_v21 }
 0x3dc   :  { %v2341_v27 = vpop.f32.mrf.mxu1 }
 0x3dd   :  { %2392 = vmatprep.mubr.f32.mxu0 %v935_v23  ;;  %v938_v31 = vadd.f32 %v2341_v27, %v922_v24 }
 0x3de   :  { %v856_v29 = vpop.f32.mrf.mxu1  ;;  %2393 = vmatmul.mubr.f32.gmra.mxu0 %v936_v25 }
 0x3df   :  { %v937_v22 = vadd.f32 %v921_v26, %v856_v29 }
 0x3e0   :  { %v2344_v45 = vpop.f32.mrf.mxu1 }
 0x3e1   :  { %2395 = vmatprep.mubr.f32.mxu0 %v937_v22  ;;  %v940_v48 = vadd.f32 %v2344_v45, %v924_v46 }
 0x3e2   :  { %v866_v47 = vpop.f32.mrf.mxu1  ;;  %2396 = vmatmul.mubr.f32.gmra.mxu0 %v938_v31 }
 0x3e3   :  { %v939_v18 = vadd.f32 %v923_v20, %v866_v47 }
 0x3e4   :  { %v2347_v49 = vpop.f32.mrf.mxu1 }
 0x3e5   :  { %2398 = vmatprep.mubr.f32.mxu0 %v939_v18  ;;  %v942_v52 = vadd.f32 %v2347_v49, %v926_v50 }
 0x3e6   :  { %v876_v51 = vpop.f32.mrf.mxu1  ;;  %2399 = vmatmul.mubr.f32.gmra.mxu0 %v940_v48 }
 0x3e7   :  { %v941_v14 = vadd.f32 %v925_v16, %v876_v51 }
 0x3e8   :  { %v2350_v53 = vpop.f32.mrf.mxu1 }
 0x3e9   :  { %2401 = vmatprep.mubr.f32.mxu0 %v941_v14  ;;  %v944_v5 = vadd.f32 %v2350_v53, %v928_v6 }
 0x3ea   :  { %v886_v61 = vpop.f32.mrf.mxu1  ;;  %2402 = vmatmul.mubr.f32.gmra.mxu0 %v942_v52 }
 0x3eb   :  { %v943_v62 = vadd.f32 %v927_v54, %v886_v61 }
 0x3ec   :  { %v2353_v63 = vpop.f32.mrf.mxu1 }
 0x3ed   :  { %2404 = vmatprep.mubr.f32.mxu0 %v943_v62  ;;  %v946_v2 = vadd.f32 %v2353_v63, %v930_v58  ;;  %v1282_v58 = vld [vmem:[#allocation15 + $0x78] sm:$0xff] }
 0x3ee   :  { %v896_v8 = vpop.f32.mrf.mxu1  ;;  %2405 = vmatmul.mubr.f32.gmra.mxu0 %v944_v5  ;;  %2525 = vmatprep.subr.mxu1 %v1282_v58 }
 0x3ef   :  { %v945_v9 = vadd.f32 %v929_v59, %v896_v8  ;;  %v1281_v8 = vld [vmem:[#allocation15 + $0x70] sm:$0xff] }
 0x3f0   :  { %v2356_v28 = vpop.f32.mrf.mxu1 }
 0x3f1   :  { %2407 = vmatprep.mubr.f32.mxu0 %v945_v9  ;;  %v948_v33 = vadd.f32 %v2356_v28, %v932_v57  ;;  %v1280_v9 = vld [vmem:[#allocation15 + $0x68] sm:$0xff]  ;;  %v1278_v28 = vld [vmem:[#allocation15 + $0x58] sm:$0xff] }
 0x3f2   :  { %v906_v30 = vpop.f32.mrf.mxu1  ;;  %2408 = vmatmul.mubr.f32.gmra.mxu0 %v946_v2  ;;  %v1279_v2 = vld [vmem:[#allocation15 + $0x60] sm:$0xff]  ;;  %v1276_v57 = vld [vmem:[#allocation15 + $0x48] sm:$0xff] }
 0x3f3   :  { %v947_v32 = vadd.f32 %v931_v7, %v906_v30  ;;  %v1277_v7 = vld [vmem:[#allocation15 + $0x50] sm:$0xff]  ;;  %v1275_v30 = vld [vmem:[#allocation15 + $0x40] sm:$0xff] }
 0x3f5   :  { %2410 = vmatprep.mubr.f32.mxu0 %v947_v32  ;;  %v1274_v32 = vld [vmem:[#allocation15 + $0x38] sm:$0xff] }
 0x3f6   :  { %2411 = vmatmul.mubr.f32.gmra.mxu0 %v948_v33  ;;  %v1273_v33 = vld [vmem:[#allocation15 + $0x30] sm:$0xff] }
 0x3f7   :  { %2501 = vmatprep.mubr.f32.mxu0 %v2681_v34  ;;  %v1272_v34 = vld [vmem:[#allocation15 + $0x28] sm:$0xff] }
 0x49a   :  { %v2391_v36 = vpop.f32.mrf.mxu0 }
 0x49b   :  { %v1027_v37 = vadd.f32 %v2391_v36, %v1840_v12 }
 0x49c   :  { %v1021_v38 = vpop.f32.mrf.mxu0 }
 0x49d   :  { %v1022_v39 = vadd.f32 %v1840_v12, %v1021_v38  ;;  %v1101_v42 = vmax.f32 %v1027_v37, 0.0 }
 0x49e   :  { %v2394_v40 = vpop.f32.mrf.mxu0 }
 0x49f   :  { %v1100_v41 = vmax.f32 %v1022_v39, 0.0  ;;  %v1037_v43 = vadd.f32 %v2394_v40, %v1840_v12 }
 0x4a0   :  { %v1031_v44 = vpop.f32.mrf.mxu0 }
 0x4a1   :  { %v1032_v3 = vadd.f32 %v1840_v12, %v1031_v44  ;;  %2445 = vmatprep.mubr.f32.mxu1 %v1100_v41  ;;  %v1103_v60 = vmax.f32 %v1037_v43, 0.0 }
 0x4a2   :  { %v2397_v1 = vpop.f32.mrf.mxu0  ;;  %2446 = vmatmul.mubr.f32.vlgmr.msra.gmra.mxu1 %v1101_v42 }
 0x4a3   :  { %v1102_v11 = vmax.f32 %v1032_v3, 0.0  ;;  %v1047_v13 = vadd.f32 %v2397_v1, %v1840_v12  ;;  %2526 = vmatpush3.msra.mxu1 %v1282_v58  ;;  %v1299_v58 = vld [vmem:[#allocation16 + $0x78] sm:$0xff] }
 0x4a4   :  { %v1041_v15 = vpop.f32.mrf.mxu0  ;;  %2527 = vmatprep.subr.mxu1 %v1281_v8 }
 0x4a5   :  { %v1042_v4 = vadd.f32 %v1840_v12, %v1041_v15  ;;  %2448 = vmatprep.mubr.f32.mxu1 %v1102_v11  ;;  %v1105_v19 = vmax.f32 %v1047_v13, 0.0  ;;  %2528 = vmatpush3.msra.mxu1 %v1281_v8  ;;  %v1841_v11 = vld [vmem:[%s3452_s10] ss:$0 sm:$0xff]  ;;  %v1298_v8 = vld [vmem:[#allocation16 + $0x70] sm:$0xff]  ;;  %s1842_s10 = sld [smem:[#allocation2 + $0x2]] }
 0x4a6   :  { %v2400_v17 = vpop.f32.mrf.mxu0  ;;  %2449 = vmatmul.mubr.f32.gmra.mxu1 %v1103_v60  ;;  %2529 = vmatprep.subr.mxu1 %v1280_v9 }
 0x4a7   :  { %v1104_v0 = vmax.f32 %v1042_v4, 0.0  ;;  %v1057_v21 = vadd.f32 %v2400_v17, %v1840_v12  ;;  %2530 = vmatpush3.msra.mxu1 %v1280_v9  ;;  %v1297_v9 = vld [vmem:[#allocation16 + $0x68] sm:$0xff] }
 0x4a8   :  { %v1051_v23 = vpop.f32.mrf.mxu0  ;;  %2531 = vmatprep.subr.mxu1 %v1279_v2 }
 0x4a9   :  { %v1052_v25 = vadd.f32 %v1840_v12, %v1051_v23  ;;  %2451 = vmatprep.mubr.f32.mxu1 %v1104_v0  ;;  %v1107_v24 = vmax.f32 %v1057_v21, 0.0  ;;  %2532 = vmatpush3.msra.mxu1 %v1279_v2  ;;  %v3342_v2 = vld [vmem:[#allocation16 + $0x60] sm:$0xff] }
 0x4aa   :  { %v2403_v27 = vpop.f32.mrf.mxu0  ;;  %2452 = vmatmul.mubr.f32.gmra.mxu1 %v1105_v19  ;;  %2533 = vmatprep.subr.mxu1 %v1278_v28 }
 0x4ab   :  { %v1106_v26 = vmax.f32 %v1052_v25, 0.0  ;;  %v1067_v29 = vadd.f32 %v2403_v27, %v1840_v12  ;;  %2534 = vmatpush3.msra.mxu1 %v1278_v28  ;;  %v3344_v28 = vld [vmem:[#allocation16 + $0x58] sm:$0xff]  ;;  %s1447_s1 = sadd.f32 1.0, %s1842_s10 }
 0x4ac   :  { %v1061_v22 = vpop.f32.mrf.mxu0  ;;  %2535 = vmatprep.subr.mxu1 %v1277_v7 }
 0x4ad   :  { %v1062_v31 = vadd.f32 %v1840_v12, %v1061_v22  ;;  %2454 = vmatprep.mubr.f32.mxu1 %v1106_v26  ;;  %v1109_v46 = vmax.f32 %v1067_v29, 0.0  ;;  %2536 = vmatpush3.msra.mxu1 %v1277_v7  ;;  %v3348_v7 = vld [vmem:[#allocation16 + $0x50] sm:$0xff] }
 0x4ae   :  { %v2406_v45 = vpop.f32.mrf.mxu0  ;;  %2455 = vmatmul.mubr.f32.gmra.mxu1 %v1107_v24  ;;  %2537 = vmatprep.subr.mxu1 %v1276_v57 }
 0x4af   :  { %v1108_v20 = vmax.f32 %v1062_v31, 0.0  ;;  %v1077_v47 = vadd.f32 %v2406_v45, %v1840_v12  ;;  %2538 = vmatpush3.msra.mxu1 %v1276_v57  ;;  %v3352_v57 = vld [vmem:[#allocation16 + $0x48] sm:$0xff] }
 0x4b0   :  { %v1071_v18 = vpop.f32.mrf.mxu0  ;;  %2539 = vmatprep.subr.mxu1 %v1275_v30 }
 0x4b1   :  { %v1072_v48 = vadd.f32 %v1840_v12, %v1071_v18  ;;  %2457 = vmatprep.mubr.f32.mxu1 %v1108_v20  ;;  %v1111_v50 = vmax.f32 %v1077_v47, 0.0  ;;  %2540 = vmatpush3.msra.mxu1 %v1275_v30  ;;  %v2683_v47 = vld [vmem:[#allocation6 + $0x10] sm:$0xff]  ;;  %v2684_v18 = vld [vmem:[#allocation6 + $0x18] sm:$0xff]  ;;  %v3356_v30 = vld [vmem:[#allocation16 + $0x40] sm:$0xff] }
 0x4b2   :  { %v2409_v49 = vpop.f32.mrf.mxu0  ;;  %2458 = vmatmul.mubr.f32.gmra.mxu1 %v1109_v46  ;;  %2541 = vmatprep.subr.mxu1 %v1274_v32  ;;  %v2682_v46 = vld [vmem:[#allocation6 + $0x8] sm:$0xff] }
 0x4b3   :  { %v1110_v16 = vmax.f32 %v1072_v48, 0.0  ;;  %v1087_v51 = vadd.f32 %v2409_v49, %v1840_v12  ;;  %2542 = vmatpush3.msra.mxu1 %v1274_v32  ;;  %v2685_v48 = vld [vmem:[#allocation6 + $0x20] sm:$0xff]  ;;  %v2686_v49 = vld [vmem:[#allocation6 + $0x28] sm:$0xff]  ;;  %v3360_v32 = vld [vmem:[#allocation16 + $0x38] sm:$0xff] }
 0x4b4   :  { %v1081_v14 = vpop.f32.mrf.mxu0  ;;  %2543 = vmatprep.subr.mxu1 %v1273_v33 }
 0x4b5   :  { %v1082_v52 = vadd.f32 %v1840_v12, %v1081_v14  ;;  %2460 = vmatprep.mubr.f32.mxu1 %v1110_v16  ;;  %v1113_v6 = vmax.f32 %v1087_v51, 0.0  ;;  %2544 = vmatpush3.msra.mxu1 %v1273_v33  ;;  %v2687_v16 = vld [vmem:[#allocation6 + $0x30] sm:$0xff]  ;;  %v2689_v51 = vld [vmem:[#allocation6 + $0x40] sm:$0xff]  ;;  %v2690_v14 = vld [vmem:[#allocation6 + $0x48] sm:$0xff] }
 0x4b6   :  { %v2412_v53 = vpop.f32.mrf.mxu0  ;;  %2461 = vmatmul.mubr.f32.gmra.mxu1 %v1111_v50  ;;  %2545 = vmatprep.subr.mxu1 %v1272_v34  ;;  %v2688_v50 = vld [vmem:[#allocation6 + $0x38] sm:$0xff]  ;;  %v3364_v33 = vld [vmem:[#allocation16 + $0x30] sm:$0xff] }
 0x4b7   :  { %v1112_v54 = vmax.f32 %v1082_v52, 0.0  ;;  %v1097_v61 = vadd.f32 %v2412_v53, %v1840_v12  ;;  %2546 = vmatpush3.msra.mxu1 %v1272_v34  ;;  %v2691_v52 = vld [vmem:[#allocation6 + $0x50] sm:$0xff]  ;;  %v2692_v53 = vld [vmem:[#allocation6 + $0x58] sm:$0xff]  ;;  %v3368_v34 = vld [vmem:[#allocation16 + $0x28] sm:$0xff] }
 0x4b8   :  { %v1091_v62 = vpop.f32.mrf.mxu0  ;;  %2547 = vmatprep.subr.mxu1 %v1271_v56 }
 0x4b9   :  { %v1092_v5 = vadd.f32 %v1840_v12, %v1091_v62  ;;  %2463 = vmatprep.mubr.f32.mxu1 %v1112_v54  ;;  %v1115_v59 = vmax.f32 %v1097_v61, 0.0  ;;  %2548 = vmatpush3.msra.mxu1 %v1271_v56  ;;  %v2693_v54 = vld [vmem:[#allocation6 + $0x60] sm:$0xff]  ;;  %v2695_v61 = vld [vmem:[#allocation6 + $0x70] sm:$0xff]  ;;  %v2696_v62 = vld [vmem:[#allocation6 + $0x78] sm:$0xff] }
 0x4ba   :  { %2464 = vmatmul.mubr.f32.gmra.mxu1 %v1113_v6  ;;  %2549 = vmatprep.subr.mxu1 %v1270_v10  ;;  %v2694_v6 = vld [vmem:[#allocation6 + $0x68] sm:$0xff]  ;;  %v3372_v56 = vld [vmem:[#allocation16 + $0x20] sm:$0xff] }
 0x4bb   :  { %v1114_v63 = vmax.f32 %v1092_v5, 0.0  ;;  %2550 = vmatpush3.msra.mxu1 %v1270_v10  ;;  %v1269_v5 = vld [vmem:[#allocation15 + $0x10] sm:$0xff]  ;;  %v3378_v10 = vstv %s1447_s1 }
 0x4bc   :  { %2551 = vmatprep.subr.mxu1 %v1269_v5 }
 0x4bd   :  { %2466 = vmatprep.mubr.f32.mxu1 %v1114_v63  ;;  %2552 = vmatpush3.msra.mxu1 %v1269_v5  ;;  %v1268_v63 = vld [vmem:[#allocation15 + $0x8] sm:$0xff] }
 0x4be   :  { %2467 = vmatmul.mubr.f32.gmra.mxu1 %v1115_v59  ;;  %2553 = vmatprep.subr.mxu1 %v1268_v63  ;;  %v1267_v59 = vld [vmem:[#allocation15] sm:$0xff] }
 0x4bf   :  { %2554 = vmatpush3.msra.mxu1 %v1268_v63 }
 0x4c0   :  { %2555 = vmatprep.subr.mxu1 %v1267_v59 }
 0x4c1   :  { %2556 = vmatpush3.msra.mxu1 %v1267_v59  ;;  %v1287_v59 = vld [vmem:[#allocation16 + $0x18] sm:$0xff] }
 0x4c2   :  { %2637 = vmatprep.subr.mxu1 %v1299_v58 }
 0x562   :  { %v2447_v35 = vpop.f32.mrf.mxu1 }
 0x563   :  { %v3332_v45 = vadd.f32 %v2447_v35, %v1841_v11 }
 0x564   :  { %v1188_v55 = vpop.f32.mrf.mxu1 }
 0x565   :  { %v3336_v20 = vadd.f32 %v1841_v11, %v1188_v55 }
 0x566   :  { %v2450_v12 = vpop.f32.mrf.mxu1 }
 0x567   :  { %v3324_v22 = vadd.f32 %v2450_v12, %v1841_v11  ;;  %v1449_v55 = vmul.f32 %v3378_v10, %v3336_v20  ;;  %v1450_v12 = vmul.f32 %v3378_v10, %v3332_v45 }
 0x568   :  { %v1198_v36 = vpop.f32.mrf.mxu1 }
 0x569   :  { %v3328_v31 = vadd.f32 %v1841_v11, %v1198_v36 }
 0x56a   :  { %v2453_v37 = vpop.f32.mrf.mxu1 }
 0x56b   :  { %v3316_v24 = vadd.f32 %v2453_v37, %v1841_v11 }
 0x56c   :  { %v1208_v38 = vpop.f32.mrf.mxu1 }
 0x56d   :  { %v3320_v29 = vadd.f32 %v1841_v11, %v1208_v38 }
 0x56e   :  { %v2456_v39 = vpop.f32.mrf.mxu1 }
 0x56f   :  { %v3308_v27 = vadd.f32 %v2456_v39, %v1841_v11 }
 0x570   :  { %v1218_v40 = vpop.f32.mrf.mxu1 }
 0x571   :  { %v3312_v26 = vadd.f32 %v1841_v11, %v1218_v40  ;;  %v1451_v40 = vmul.f32 %v3378_v10, %v3328_v31 }
 0x572   :  { %v2459_v41 = vpop.f32.mrf.mxu1 }
 0x573   :  { %v3300_v23 = vadd.f32 %v2459_v41, %v1841_v11  ;;  %v1452_v41 = vmul.f32 %v3378_v10, %v3324_v22 }
 0x574   :  { %v1228_v42 = vpop.f32.mrf.mxu1 }
 0x575   :  { %v3304_v25 = vadd.f32 %v1841_v11, %v1228_v42 }
 0x576   :  { %v2462_v43 = vpop.f32.mrf.mxu1 }
 0x577   :  { %v3292_v19 = vadd.f32 %v2462_v43, %v1841_v11 }
 0x578   :  { %v1238_v44 = vpop.f32.mrf.mxu1 }
 0x579   :  { %v3296_v21 = vadd.f32 %v1841_v11, %v1238_v44 }
 0x57a   :  { %v2465_v3 = vpop.f32.mrf.mxu1 }
 0x57b   :  { %v3284_v17 = vadd.f32 %v2465_v3, %v1841_v11 }
 0x57c   :  { %v1248_v1 = vpop.f32.mrf.mxu1 }
 0x57d   :  { %v3288_v0 = vadd.f32 %v1841_v11, %v1248_v1  ;;  %v1453_v1 = vmul.f32 %v3378_v10, %v3320_v29 }
 0x57e   :  { %v2468_v60 = vpop.f32.mrf.mxu1 }
 0x57f   :  { %v3278_v13 = vadd.f32 %v2468_v60, %v1841_v11 }
 0x580   :  { %v1258_v15 = vpop.f32.mrf.mxu1 }
 0x581   :  { %v3280_v4 = vadd.f32 %v1841_v11, %v1258_v15  ;;  %2469 = vmatprep.subr.mxu0 %v3278_v13  ;;  %v1454_v11 = vmul.f32 %v3378_v10, %v3316_v24 }
 0x582   :  { %2470 = vmatpush3.msra.mxu0 %v3278_v13 }
 0x583   :  { %2471 = vmatprep.subr.mxu0 %v3280_v4 }
 0x584   :  { %2472 = vmatpush3.msra.mxu0 %v3280_v4 }
 0x585   :  { %2473 = vmatprep.subr.mxu0 %v3284_v17 }
 0x586   :  { %2474 = vmatpush3.msra.mxu0 %v3284_v17 }
 0x587   :  { %2475 = vmatprep.subr.mxu0 %v3288_v0 }
 0x588   :  { %2476 = vmatpush3.msra.mxu0 %v3288_v0 }
 0x589   :  { %2477 = vmatprep.subr.mxu0 %v3292_v19 }
 0x58a   :  { %2478 = vmatpush3.msra.mxu0 %v3292_v19 }
 0x58b   :  { %2479 = vmatprep.subr.mxu0 %v3296_v21 }
 0x58c   :  { %2480 = vmatpush3.msra.mxu0 %v3296_v21 }
 0x58d   :  { %2481 = vmatprep.subr.mxu0 %v3300_v23 }
 0x58e   :  { %2482 = vmatpush3.msra.mxu0 %v3300_v23 }
 0x58f   :  { %2483 = vmatprep.subr.mxu0 %v3304_v25 }
 0x590   :  { %2484 = vmatpush3.msra.mxu0 %v3304_v25 }
 0x591   :  { %2485 = vmatprep.subr.mxu0 %v3308_v27 }
 0x592   :  { %2486 = vmatpush3.msra.mxu0 %v3308_v27 }
 0x593   :  { %2487 = vmatprep.subr.mxu0 %v3312_v26 }
 0x594   :  { %2488 = vmatpush3.msra.mxu0 %v3312_v26 }
 0x595   :  { %2489 = vmatprep.subr.mxu0 %v3316_v24 }
 0x596   :  { %2490 = vmatpush3.msra.mxu0 %v3316_v24 }
 0x597   :  { %2491 = vmatprep.subr.mxu0 %v3320_v29 }
 0x598   :  { %2492 = vmatpush3.msra.mxu0 %v3320_v29  ;;  %v1456_v29 = vmul.f32 %v3378_v10, %v3308_v27  ;;  %v1458_v27 = vmul.f32 %v3378_v10, %v3300_v23  ;;  %v1460_v23 = vmul.f32 %v3378_v10, %v3292_v19  ;;  %v1462_v19 = vmul.f32 %v3378_v10, %v3284_v17 }
 0x599   :  { %2493 = vmatprep.subr.mxu0 %v3324_v22  ;;  %v1464_v17 = vmul.f32 %v3378_v10, %v3278_v13  ;;  %v1284_v13 = vld [vmem:[#allocation16] sm:$0xff] }
 0x59a   :  { %2494 = vmatpush3.msra.mxu0 %v3324_v22 }
 0x59b   :  { %2495 = vmatprep.subr.mxu0 %v3328_v31 }
 0x59c   :  { %2496 = vmatpush3.msra.mxu0 %v3328_v31 }
 0x59d   :  { %2497 = vmatprep.subr.mxu0 %v3332_v45 }
 0x59e   :  { %2498 = vmatpush3.msra.mxu0 %v3332_v45  ;;  %v1455_v45 = vmul.f32 %v3378_v10, %v3312_v26  ;;  %v1457_v26 = vmul.f32 %v3378_v10, %v3304_v25  ;;  %v1459_v25 = vmul.f32 %v3378_v10, %v3296_v21  ;;  %v1461_v21 = vmul.f32 %v3378_v10, %v3288_v0 }
 0x59f   :  { %2499 = vmatprep.subr.mxu0 %v3336_v20  ;;  %v1463_v0 = vmul.f32 %v3378_v10, %v3280_v4  ;;  %v1285_v4 = vld [vmem:[#allocation16 + $0x8] sm:$0xff] }
 0x5a0   :  { %2500 = vmatpush3.msra.mxu0 %v3336_v20 }
 0x5a1   :  { %2502 = vmatmul.mubr.f32.vlgmr.msra.gmra.mxu0 %v2682_v46  ;;  %2581 = vmatprep.subr.mxu0 %v1299_v58 }
 0x5a2   :  { %2504 = vmatprep.mubr.f32.mxu0 %v2683_v47  ;;  %2582 = vmatpush3.msra.mxu0 %v1299_v58 }
 0x5a3   :  { %2583 = vmatprep.subr.mxu0 %v1298_v8 }
 0x5a4   :  { %2584 = vmatpush3.msra.mxu0 %v1298_v8 }
 0x5a5   :  { %2505 = vmatmul.mubr.f32.gmra.mxu0 %v2684_v18  ;;  %2585 = vmatprep.subr.mxu0 %v1297_v9 }
 0x5a6   :  { %2507 = vmatprep.mubr.f32.mxu0 %v2685_v48  ;;  %2586 = vmatpush3.msra.mxu0 %v1297_v9 }
 0x5a7   :  { %2587 = vmatprep.subr.mxu0 %v3342_v2 }
 0x5a8   :  { %2588 = vmatpush3.msra.mxu0 %v3342_v2 }
 0x5a9   :  { %2508 = vmatmul.mubr.f32.gmra.mxu0 %v2686_v49  ;;  %2589 = vmatprep.subr.mxu0 %v3344_v28 }
 0x5aa   :  { %2510 = vmatprep.mubr.f32.mxu0 %v2687_v16  ;;  %2590 = vmatpush3.msra.mxu0 %v3344_v28 }
 0x5ab   :  { %2591 = vmatprep.subr.mxu0 %v3348_v7 }
 0x5ac   :  { %2592 = vmatpush3.msra.mxu0 %v3348_v7 }
 0x5ad   :  { %2511 = vmatmul.mubr.f32.gmra.mxu0 %v2688_v50  ;;  %2593 = vmatprep.subr.mxu0 %v3352_v57 }
 0x5ae   :  { %2513 = vmatprep.mubr.f32.mxu0 %v2689_v51  ;;  %2594 = vmatpush3.msra.mxu0 %v3352_v57 }
 0x5af   :  { %2595 = vmatprep.subr.mxu0 %v3356_v30 }
 0x5b0   :  { %2596 = vmatpush3.msra.mxu0 %v3356_v30 }
 0x5b1   :  { %2514 = vmatmul.mubr.f32.gmra.mxu0 %v2690_v14  ;;  %2597 = vmatprep.subr.mxu0 %v3360_v32 }
 0x5b2   :  { %2516 = vmatprep.mubr.f32.mxu0 %v2691_v52  ;;  %2598 = vmatpush3.msra.mxu0 %v3360_v32 }
 0x5b3   :  { %2599 = vmatprep.subr.mxu0 %v3364_v33 }
 0x5b4   :  { %2600 = vmatpush3.msra.mxu0 %v3364_v33 }
 0x5b5   :  { %2517 = vmatmul.mubr.f32.gmra.mxu0 %v2692_v53  ;;  %2601 = vmatprep.subr.mxu0 %v3368_v34 }
 0x5b6   :  { %2519 = vmatprep.mubr.f32.mxu0 %v2693_v54  ;;  %2602 = vmatpush3.msra.mxu0 %v3368_v34 }
 0x5b7   :  { %2603 = vmatprep.subr.mxu0 %v3372_v56 }
 0x5b8   :  { %2604 = vmatpush3.msra.mxu0 %v3372_v56 }
 0x5b9   :  { %2520 = vmatmul.mubr.f32.gmra.mxu0 %v2694_v6  ;;  %2605 = vmatprep.subr.mxu0 %v1287_v59 }
 0x5ba   :  { %2522 = vmatprep.mubr.f32.mxu0 %v2695_v61  ;;  %2606 = vmatpush3.msra.mxu0 %v1287_v59 }
 0x5bd   :  { %2523 = vmatmul.mubr.f32.gmra.mxu0 %v2696_v62 }
 0x661   :  { %v2503_v35 = vpop.f32.mrf.mxu0 }
 0x662   :  { %v1466_v38 = vadd.f32 %v2503_v35, %v1450_v12 }
 0x663   :  { %v1368_v36 = vpop.f32.mrf.mxu0 }
 0x664   :  { %v1465_v37 = vadd.f32 %v1449_v55, %v1368_v36 }
 0x665   :  { %v2506_v39 = vpop.f32.mrf.mxu0 }
 0x666   :  { %2557 = vmatprep.mubr.f32.mxu1 %v1465_v37  ;;  %v1468_v44 = vadd.f32 %v2506_v39, %v1452_v41 }
 0x667   :  { %v1378_v42 = vpop.f32.mrf.mxu0  ;;  %2558 = vmatmul.mubr.f32.vlgmr.msra.gmra.mxu1 %v1466_v38 }
 0x668   :  { %v1467_v43 = vadd.f32 %v1451_v40, %v1378_v42  ;;  %2653 = vmatpush3.msra.mxu1 %v1299_v58  ;;  %v1286_v58 = vld [vmem:[#allocation16 + $0x10] sm:$0xff] }
 0x669   :  { %v2509_v3 = vpop.f32.mrf.mxu0  ;;  %2638 = vmatprep.subr.mxu1 %v1298_v8  ;;  %2607 = vmatprep.subr.mxu0 %v1286_v58 }
 0x66a   :  { %2560 = vmatprep.mubr.f32.mxu1 %v1467_v43  ;;  %2654 = vmatpush3.msra.mxu1 %v1298_v8  ;;  %v1470_v22 = vadd.f32 %v2509_v3, %v1454_v11  ;;  %v1843_v8 = vld [vmem:[%s3454_s12] ss:$0 sm:$0xff] }
 0x66b   :  { %v1388_v60 = vpop.f32.mrf.mxu0  ;;  %2561 = vmatmul.mubr.f32.gmra.mxu1 %v1468_v44  ;;  %2639 = vmatprep.subr.mxu1 %v1297_v9 }
 0x66c   :  { %v1469_v15 = vadd.f32 %v1453_v1, %v1388_v60  ;;  %2655 = vmatpush3.msra.mxu1 %v1297_v9  ;;  %2608 = vmatpush3.msra.mxu0 %v1286_v58 }
 0x66d   :  { %v2512_v31 = vpop.f32.mrf.mxu0  ;;  %2640 = vmatprep.subr.mxu1 %v3342_v2  ;;  %2609 = vmatprep.subr.mxu0 %v1285_v4 }
 0x66e   :  { %2563 = vmatprep.mubr.f32.mxu1 %v1469_v15  ;;  %2656 = vmatpush3.msra.mxu1 %v3342_v2  ;;  %v1472_v46 = vadd.f32 %v2512_v31, %v1456_v29 }
 0x66f   :  { %v1398_v20 = vpop.f32.mrf.mxu0  ;;  %2564 = vmatmul.mubr.f32.gmra.mxu1 %v1470_v22  ;;  %2641 = vmatprep.subr.mxu1 %v3344_v28 }
 0x670   :  { %v1471_v24 = vadd.f32 %v1455_v45, %v1398_v20  ;;  %2657 = vmatpush3.msra.mxu1 %v3344_v28  ;;  %2610 = vmatpush3.msra.mxu0 %v1285_v4 }
 0x671   :  { %v2515_v47 = vpop.f32.mrf.mxu0  ;;  %2642 = vmatprep.subr.mxu1 %v3348_v7  ;;  %2611 = vmatprep.subr.mxu0 %v1284_v13 }
 0x672   :  { %2566 = vmatprep.mubr.f32.mxu1 %v1471_v24  ;;  %2658 = vmatpush3.msra.mxu1 %v3348_v7  ;;  %v1474_v49 = vadd.f32 %v2515_v47, %v1458_v27 }
 0x673   :  { %v1408_v18 = vpop.f32.mrf.mxu0  ;;  %2567 = vmatmul.mubr.f32.gmra.mxu1 %v1472_v46  ;;  %2643 = vmatprep.subr.mxu1 %v3352_v57 }
 0x674   :  { %v1473_v48 = vadd.f32 %v1457_v26, %v1408_v18  ;;  %2659 = vmatpush3.msra.mxu1 %v3352_v57  ;;  %2612 = vmatpush3.msra.mxu0 %v1284_v13 }
 0x675   :  { %v2518_v16 = vpop.f32.mrf.mxu0  ;;  %2644 = vmatprep.subr.mxu1 %v3356_v30 }
 0x676   :  { %2569 = vmatprep.mubr.f32.mxu1 %v1473_v48  ;;  %2660 = vmatpush3.msra.mxu1 %v3356_v30  ;;  %v1476_v14 = vadd.f32 %v2518_v16, %v1460_v23 }
 0x677   :  { %v1418_v50 = vpop.f32.mrf.mxu0  ;;  %2570 = vmatmul.mubr.f32.gmra.mxu1 %v1474_v49  ;;  %2645 = vmatprep.subr.mxu1 %v3360_v32 }
 0x678   :  { %v1475_v51 = vadd.f32 %v1459_v25, %v1418_v50  ;;  %2661 = vmatpush3.msra.mxu1 %v3360_v32 }
 0x679   :  { %v2521_v52 = vpop.f32.mrf.mxu0  ;;  %2646 = vmatprep.subr.mxu1 %v3364_v33 }
 0x67a   :  { %2572 = vmatprep.mubr.f32.mxu1 %v1475_v51  ;;  %2662 = vmatpush3.msra.mxu1 %v3364_v33  ;;  %v1478_v6 = vadd.f32 %v2521_v52, %v1462_v19 }
 0x67b   :  { %v1428_v53 = vpop.f32.mrf.mxu0  ;;  %2573 = vmatmul.mubr.f32.gmra.mxu1 %v1476_v14  ;;  %2647 = vmatprep.subr.mxu1 %v3368_v34 }
 0x67c   :  { %v1477_v54 = vadd.f32 %v1461_v21, %v1428_v53  ;;  %2663 = vmatpush3.msra.mxu1 %v3368_v34  ;;  %v1844_v21 = vld [vmem:[%s3456_s14] ss:$0 sm:$0xff]  ;;  %s2910_s14 = smov [#allocation18]  }
 0x67d   :  { %v2524_v61 = vpop.f32.mrf.mxu0  ;;  %2648 = vmatprep.subr.mxu1 %v3372_v56  ;;  %s1820_s20 = sshll.u32 %s2910_s14, 4  ;;  %s1821_s20 = int_to_ptr.vmem [resolvable:$true] %s1820_s20 }
 0x67e   :  { %2575 = vmatprep.mubr.f32.mxu1 %v1477_v54  ;;  %2664 = vmatpush3.msra.mxu1 %v3372_v56  ;;  %v1480_v63 = vadd.f32 %v2524_v61, %v1464_v17  ;;  %s2865_s5 = scalar_lea.vmem %s1821_s20, 2048  ;;  %p2870_p13 = scmp.lt.s32.totalorder %s1821_s20, %s1821_s20 }
 0x67f   :  { %v1438_v62 = vpop.f32.mrf.mxu0  ;;  %2576 = vmatmul.mubr.f32.gmra.mxu1 %v1478_v6  ;;  %2649 = vmatprep.subr.mxu1 %v1287_v59  ;;  %p2866_p12 = scmp.ne.s32.totalorder %s1821_s20, %s2865_s5  ;;  %p2871_p0 = scmp.lt.s32.totalorder %s2865_s5, %s2865_s5 }
 0x680   :  { %v1479_v5 = vadd.f32 %v1463_v0, %v1438_v62  ;;  %2665 = vmatpush3.msra.mxu1 %v1287_v59 }
 0x681   :  { %2650 = vmatprep.subr.mxu1 %v1286_v58  ;;  %p2872_p1 = por %p2871_p0, %p2870_p13 }
 0x682   :  { %2578 = vmatprep.mubr.f32.mxu1 %v1479_v5  ;;  %2666 = vmatpush3.msra.mxu1 %v1286_v58 }
 0x683   :  { %2579 = vmatmul.mubr.f32.gmra.mxu1 %v1480_v63  ;;  %2651 = vmatprep.subr.mxu1 %v1285_v4  ;;  %p2873_p2 = pnand %p2872_p1, %p2866_p12 }
 0x684   :  { %2667 = vmatpush3.msra.mxu1 %v1285_v4 }
 0x685   :  { %2652 = vmatprep.subr.mxu1 %v1284_v13 }
 0x686   :  { %2668 = vmatpush3.msra.mxu1 %v1284_v13 }
 0x727   :  { %v2559_v9 = vpop.f32.mrf.mxu1 }
 0x728   :  { %v1559_v2 = vadd.f32 %v2559_v9, %v1843_v8 }
 0x729   :  { %v1553_v28 = vpop.f32.mrf.mxu1 }
 0x72a   :  { %v1554_v7 = vadd.f32 %v1843_v8, %v1553_v28  ;;  %v1633_v32 = vmax.f32 %v1559_v2, 0.0 }
 0x72b   :  { %v2562_v57 = vpop.f32.mrf.mxu1 }
 0x72c   :  { %v1632_v30 = vmax.f32 %v1554_v7, 0.0  ;;  %v1569_v33 = vadd.f32 %v2562_v57, %v1843_v8 }
 0x72d   :  { %v1563_v34 = vpop.f32.mrf.mxu1 }
 0x72e   :  { %v1564_v56 = vadd.f32 %v1843_v8, %v1563_v34  ;;  %2613 = vmatprep.mubr.f32.mxu0 %v1632_v30  ;;  %v1635_v55 = vmax.f32 %v1569_v33, 0.0 }
 0x72f   :  { %v2565_v10 = vpop.f32.mrf.mxu1  ;;  %2614 = vmatmul.mubr.f32.vlgmr.msra.gmra.mxu0 %v1633_v32 }
 0x730   :  { %v1634_v35 = vmax.f32 %v1564_v56, 0.0  ;;  %v1579_v12 = vadd.f32 %v2565_v10, %v1843_v8 }
 0x731   :  { %v1573_v36 = vpop.f32.mrf.mxu1 }
 0x732   :  { %v1574_v37 = vadd.f32 %v1843_v8, %v1573_v36  ;;  %2616 = vmatprep.mubr.f32.mxu0 %v1634_v35  ;;  %v1637_v40 = vmax.f32 %v1579_v12, 0.0 }
 0x733   :  { %v2568_v38 = vpop.f32.mrf.mxu1  ;;  %2617 = vmatmul.mubr.f32.gmra.mxu0 %v1635_v55 }
 0x734   :  { %v1636_v39 = vmax.f32 %v1574_v37, 0.0  ;;  %v1589_v41 = vadd.f32 %v2568_v38, %v1843_v8 }
 0x735   :  { %v1583_v42 = vpop.f32.mrf.mxu1 }
 0x736   :  { %v1584_v43 = vadd.f32 %v1843_v8, %v1583_v42  ;;  %2619 = vmatprep.mubr.f32.mxu0 %v1636_v39  ;;  %v1639_v1 = vmax.f32 %v1589_v41, 0.0 }
 0x737   :  { %v2571_v44 = vpop.f32.mrf.mxu1  ;;  %2620 = vmatmul.mubr.f32.gmra.mxu0 %v1637_v40 }
 0x738   :  { %v1638_v3 = vmax.f32 %v1584_v43, 0.0  ;;  %v1599_v11 = vadd.f32 %v2571_v44, %v1843_v8 }
 0x739   :  { %v1593_v60 = vpop.f32.mrf.mxu1 }
 0x73a   :  { %v1594_v15 = vadd.f32 %v1843_v8, %v1593_v60  ;;  %2622 = vmatprep.mubr.f32.mxu0 %v1638_v3  ;;  %v1641_v45 = vmax.f32 %v1599_v11, 0.0 }
 0x73b   :  { %v2574_v22 = vpop.f32.mrf.mxu1  ;;  %2623 = vmatmul.mubr.f32.gmra.mxu0 %v1639_v1 }
 0x73c   :  { %v1640_v31 = vmax.f32 %v1594_v15, 0.0  ;;  %v1609_v29 = vadd.f32 %v2574_v22, %v1843_v8 }
 0x73d   :  { %v1603_v20 = vpop.f32.mrf.mxu1 }
 0x73e   :  { %v1604_v24 = vadd.f32 %v1843_v8, %v1603_v20  ;;  %2625 = vmatprep.mubr.f32.mxu1 %v1640_v31  ;;  %v1643_v26 = vmax.f32 %v1609_v29, 0.0 }
 0x73f   :  { %v2577_v46 = vpop.f32.mrf.mxu1  ;;  %2626 = vmatmul.mubr.f32.vlgmr.msra.gmra.mxu1 %v1641_v45 }
 0x740   :  { %v1642_v47 = vmax.f32 %v1604_v24, 0.0  ;;  %v1619_v27 = vadd.f32 %v2577_v46, %v1843_v8 }
 0x741   :  { %v1613_v18 = vpop.f32.mrf.mxu1 }
 0x742   :  { %v1614_v48 = vadd.f32 %v1843_v8, %v1613_v18  ;;  %2628 = vmatprep.mubr.f32.mxu1 %v1642_v47  ;;  %v1645_v25 = vmax.f32 %v1619_v27, 0.0 }
 0x743   :  { %v2580_v49 = vpop.f32.mrf.mxu1  ;;  %2629 = vmatmul.mubr.f32.gmra.mxu1 %v1643_v26 }
 0x744   :  { %v1644_v16 = vmax.f32 %v1614_v48, 0.0  ;;  %v1629_v23 = vadd.f32 %v2580_v49, %v1843_v8 }
 0x745   :  { %v1623_v50 = vpop.f32.mrf.mxu1 }
 0x746   :  { %v1624_v51 = vadd.f32 %v1843_v8, %v1623_v50  ;;  %2631 = vmatprep.mubr.f32.mxu1 %v1644_v16  ;;  %v1647_v52 = vmax.f32 %v1629_v23, 0.0 }
 0x747   :  { %2632 = vmatmul.mubr.f32.gmra.mxu1 %v1645_v25 }
 0x748   :  { %v1646_v14 = vmax.f32 %v1624_v51, 0.0 }
 0x74a   :  { %2634 = vmatprep.mubr.f32.mxu1 %v1646_v14 }
 0x74b   :  { %2635 = vmatmul.mubr.f32.gmra.mxu1 %v1647_v52 }
 0x7ef   :  { %v2615_v19 = vpop.f32.mrf.mxu0 }
 0x7f0   :  { %v1726_v53 = vadd.f32 %v2615_v19, %v1844_v21 }
 0x7f1   :  { %v1720_v54 = vpop.f32.mrf.mxu0 }
 0x7f2   :  { %1800 = vst [vmem:[#allocation18 + $0x8] sm:$0xff] %v1726_v53  ;;  %v1721_v6 = vadd.f32 %v1844_v21, %v1720_v54 }
 0x7f3   :  { %v2618_v61 = vpop.f32.mrf.mxu0 }
 0x7f4   :  { %1799 = vst [vmem:[#allocation18] sm:$0xff] %v1721_v6  ;;  %v1736_v0 = vadd.f32 %v2618_v61, %v1844_v21 }
 0x7f5   :  { %v1730_v17 = vpop.f32.mrf.mxu0 }
 0x7f6   :  { %1802 = vst [vmem:[#allocation18 + $0x18] sm:$0xff] %v1736_v0  ;;  %v1731_v62 = vadd.f32 %v1844_v21, %v1730_v17 }
 0x7f7   :  { %v2621_v5 = vpop.f32.mrf.mxu0 }
 0x7f8   :  { %1801 = vst [vmem:[#allocation18 + $0x10] sm:$0xff] %v1731_v62  ;;  %v1746_v63 = vadd.f32 %v2621_v5, %v1844_v21 }
 0x7f9   :  { %v1740_v59 = vpop.f32.mrf.mxu0 }
 0x7fa   :  { %1804 = vst [vmem:[#allocation18 + $0x28] sm:$0xff] %v1746_v63  ;;  %v1741_v58 = vadd.f32 %v1844_v21, %v1740_v59 }
 0x7fb   :  { %v2624_v4 = vpop.f32.mrf.mxu0 }
 0x7fc   :  { %1803 = vst [vmem:[#allocation18 + $0x20] sm:$0xff] %v1741_v58  ;;  %v1756_v13 = vadd.f32 %v2624_v4, %v1844_v21 }
 0x7fd   :  { %v1750_v8 = vpop.f32.mrf.mxu0 }
 0x7fe   :  { %1806 = vst [vmem:[#allocation18 + $0x38] sm:$0xff] %v1756_v13  ;;  %v1751_v9 = vadd.f32 %v1844_v21, %v1750_v8 }
 0x7ff   :  { %v2627_v2 = vpop.f32.mrf.mxu1 }
 0x800   :  { %1805 = vst [vmem:[#allocation18 + $0x30] sm:$0xff] %v1751_v9  ;;  %v1766_v28 = vadd.f32 %v2627_v2, %v1844_v21 }
 0x801   :  { %v1760_v7 = vpop.f32.mrf.mxu1 }
 0x802   :  { %1808 = vst [vmem:[#allocation18 + $0x48] sm:$0xff] %v1766_v28  ;;  %v1761_v57 = vadd.f32 %v1844_v21, %v1760_v7 }
 0x803   :  { %v2630_v30 = vpop.f32.mrf.mxu1 }
 0x804   :  { %1807 = vst [vmem:[#allocation18 + $0x40] sm:$0xff] %v1761_v57  ;;  %v1776_v32 = vadd.f32 %v2630_v30, %v1844_v21 }
 0x805   :  { %v1770_v33 = vpop.f32.mrf.mxu1 }
 0x806   :  { %1810 = vst [vmem:[#allocation18 + $0x58] sm:$0xff] %v1776_v32  ;;  %v1771_v34 = vadd.f32 %v1844_v21, %v1770_v33 }
 0x807   :  { %v2633_v56 = vpop.f32.mrf.mxu1 }
 0x808   :  { %1809 = vst [vmem:[#allocation18 + $0x50] sm:$0xff] %v1771_v34  ;;  %v1786_v10 = vadd.f32 %v2633_v56, %v1844_v21 }
 0x809   :  { %v1780_v35 = vpop.f32.mrf.mxu1 }
 0x80a   :  { %1812 = vst [vmem:[#allocation18 + $0x68] sm:$0xff] %v1786_v10  ;;  %v1781_v55 = vadd.f32 %v1844_v21, %v1780_v35 }
 0x80b   :  { %v2636_v12 = vpop.f32.mrf.mxu1 }
 0x80c   :  { %1811 = vst [vmem:[#allocation18 + $0x60] sm:$0xff] %v1781_v55  ;;  %v1796_v36 = vadd.f32 %v2636_v12, %v1844_v21 }
 0x80d   :  { %v1790_v37 = vpop.f32.mrf.mxu1 }
 0x80e   :  { %1814 = vst [vmem:[#allocation18 + $0x78] sm:$0xff] %v1796_v36  ;;  %v1791_v38 = vadd.f32 %v1844_v21, %v1790_v37 }
 0x810   :  { %1813 = vst [vmem:[#allocation18 + $0x70] sm:$0xff] %v1791_v38 }
 0x811   :  { %2876 = shalt.err (!%p2873_p2)
}
 0x812   :  { %1826 = dma.vmem_to_hbm [thread:$0]  %s1821_s20, 2048, %s3457_s15, [#allocation4], %s2901_s23, %s2901_s23, %s2902_s24  }
 0x813   :  { %2897 = dma.done.wait [#allocation4], 2048  }
 0x814   :  { %2898 = vsyncadd [#allocation4], 4294965248 }
 0x815   :  { %1830 = vsyncpa [#allocation3], 1 }
 0x816   :  { %1831 = vsyncpa [#allocation8], 1 }
 0x817   :  { %1832 = vsyncpa [#allocation11], 1 }
 0x818   :  { %1833 = vsyncpa [#allocation14], 1 }
 0x819   :  { %1834 = vsyncpa [#allocation17], 1 }
 0x81a   :  { %1835 = vsyncpa [#allocation4], 1 }
 0x81b   :  { %1836 = vsyncpa [#allocation5], 1 }

</bundles_post_ra>
